<compile_context>
chip_gen: v5e
topology: v5e:2x2
jax: 0.10.0
libtpu: 0.0.40
codegen_flags: <defaults>
</compile_context>

<pallas_src>
import functools

import jax
import jax.numpy as jnp
from jax.experimental import pallas as pl
from jax.experimental.pallas import tpu as pltpu

NEG_SLOPE = 0.01            # nn.LeakyReLU default
IN_FEATURES = 100 * 32      # 3200 = 25 * 128 (lane aligned)
NUM_CLASSES = 3


def _leaky_relu(z):
    return jnp.where(z >= 0, z, NEG_SLOPE * z)


def mlp_kernel(x_ref,
               w1_ref, b1_ref,
               w2_ref, b2_ref,
               w3_ref, b3_ref,
               w4_ref, b4_ref,
               o_ref,
               *, total_rows, tile_rows, mask_tail):
    # x_ref: (TB, 3200) tile of the batch; weights/biases: VMEM-resident.
    x = x_ref[...]
    w1 = w1_ref[...]
    if x.dtype != w1.dtype:
        # fp32 x + bf16 W1 (v5e path): cast in-kernel — no extra HBM bytes,
        # full-rate bf16 MXU, fp32 accumulation below.
        x = x.astype(w1.dtype)

    h = jnp.dot(x, w1, preferred_element_type=jnp.float32) + b1_ref[...]
    h = _leaky_relu(h)                                                   # (TB, 128)

    h = jnp.dot(h, w2_ref[...], preferred_element_type=jnp.float32) + b2_ref[...]
    h = _leaky_relu(h)                                                   # (TB, 64)

    h = jnp.dot(h, w3_ref[...], preferred_element_type=jnp.float32) + b3_ref[...]
    h = _leaky_relu(h)                                                   # (TB, 64)

    logits = jnp.dot(h, w4_ref[...], preferred_element_type=jnp.float32) + b4_ref[...]  # (TB, 3)

    if mask_tail:
        # Rows past the real batch in the (partially valid) last block hold
        # garbage; zero their logits so exp() stays finite.  Those output rows
        # are outside the (B, 3) array and dropped on writeback anyway.
        row = (pl.program_id(0) * tile_rows
               + jax.lax.broadcasted_iota(jnp.int32, (tile_rows, 1), 0))
        logits = jnp.where(row < total_rows, logits, 0.0)

    # numerically stable softmax over the class axis
    m = jnp.max(logits, axis=-1, keepdims=True)
    e = jnp.exp(logits - m)
    o_ref[...] = (e / jnp.sum(e, axis=-1, keepdims=True)).astype(o_ref.dtype)


def _device_config(x_is_bf16):
    """(max batch tile, scoped-VMEM limit bytes, force bf16 layer-1) per gen."""
    try:
        kind = jax.devices()[0].device_kind.lower()
    except Exception:
        kind = ""
    if "v5" in kind:
        # Raise the 16 MiB default scoped cap (physical VMEM is 128 MiB) so TB
        # matches v6e, and force bf16 layer-1: v5e has no fast fp32 MXU path.
        return 1024, 64 * 1024 * 1024, True
    if "v6" in kind:
        return 1024, 64 * 1024 * 1024, False
    if "v7" in kind:
        # 64 MiB/TC part, 3.2 TB/s HBM: bigger tiles amortize the ~0.35 us
        # per-grid-step overhead; explicit 48 MiB scoped limit.
        return (2048 if x_is_bf16 else 1024), 48 * 1024 * 1024, False
    return 256, None, False   # conservative fallback for unknown devices


def _round_up(x, m):
    return ((x + m - 1) // m) * m


def _resident_spec(shape):
    """Constant-index (fetched once, VMEM-resident) spec, single-buffered."""
    idx = lambda i: (0, 0)
    try:
        return pl.BlockSpec(shape, idx, pipeline_mode=pl.Buffered(1))
    except Exception:   # older jax without pipeline_mode / Buffered
        return pl.BlockSpec(shape, idx)


def mlp_forward(x, params, *, l1_dtype=None):
    """x: any shape whose total size is B*3200 (e.g. (B, 100, 32)).

    x may arrive as float32 or bfloat16; a bf16 x halves the dominant HBM
    stream (note: this quantizes the input activations, probabilities can
    shift by O(1e-2)).  Output probabilities are always float32.
    `l1_dtype` overrides the layer-1 matmul dtype (default: per-device).
    """
    x2d = x.reshape(-1, IN_FEATURES)
    if x2d.dtype.name not in ("float32", "bfloat16"):
        x2d = x2d.astype(jnp.float32)
    B = x2d.shape[0]
    x_is_bf16 = x2d.dtype.name == "bfloat16"

    tb_max, vmem_limit, force_bf16_l1 = _device_config(x_is_bf16)
    if l1_dtype is None:
        l1_dtype = jnp.bfloat16 if (x_is_bf16 or force_bf16_l1) else jnp.float32

    # Batch tile: multiple of 16 (legal sublane count for fp32 and bf16),
    # generation-capped, shrunk for tiny batches.
    TB = min(tb_max, _round_up(max(B, 1), 16))
    num_tiles = pl.cdiv(B, TB)
    mask_tail = (B % TB) != 0

    (w1, b1), (w2, b2), (w3, b3), (w4, b4) = params
    if w1.dtype != l1_dtype:
        # tiny (<=1.6 MB) convert; callers can pre-cast & cache w1 to skip it.
        w1 = w1.astype(l1_dtype)
    args = (x2d, w1, b1, w2, b2, w3, b3, w4, b4)

    in_specs = [pl.BlockSpec((TB, IN_FEATURES), lambda i: (i, 0))] + \
               [_resident_spec(a.shape) for a in args[1:]]
    out_spec = pl.BlockSpec((TB, NUM_CLASSES), lambda i: (i, 0))

    flops = 2 * B * (IN_FEATURES * 128 + 128 * 64 + 64 * 64 + 64 * NUM_CLASSES)
    bytes_accessed = (B * IN_FEATURES * x2d.dtype.itemsize
                      + sum(int(a.size) * a.dtype.itemsize for a in args[1:])
                      + B * NUM_CLASSES * 4)
    try:
        cost = pl.CostEstimate(flops=flops, transcendentals=B * NUM_CLASSES,
                               bytes_accessed=bytes_accessed)
    except Exception:
        cost = None

    kernel = functools.partial(mlp_kernel, total_rows=B, tile_rows=TB,
                               mask_tail=mask_tail)

    return pl.pallas_call(
        kernel,
        out_shape=jax.ShapeDtypeStruct((B, NUM_CLASSES), jnp.float32),
        grid_spec=pltpu.PrefetchScalarGridSpec(
            num_scalar_prefetch=0,
            grid=(num_tiles,),
            in_specs=in_specs,
            out_specs=out_spec,
        ),
        compiler_params=pltpu.CompilerParams(
            dimension_semantics=("parallel",),
            vmem_limit_bytes=vmem_limit,
        ),
        cost_estimate=cost,
    )(*args)


def init_params(key):
    """Deterministic init mimicking nn.Linear (uniform +/- 1/sqrt(fan_in)).

    Weights are stored pre-transposed as (in, out); biases as (1, out).
    """
    dims = [(IN_FEATURES, 128), (128, 64), (64, 64), (64, NUM_CLASSES)]
    params = []
    for (fan_in, fan_out) in dims:
        key, kw, kb = jax.random.split(key, 3)
        bound = 1.0 / jnp.sqrt(jnp.float32(fan_in))
        w = jax.random.uniform(kw, (fan_in, fan_out), jnp.float32, -bound, bound)
        b = jax.random.uniform(kb, (1, fan_out), jnp.float32, -bound, bound)
        params.append((w, b))
    return params


def mlp_reference(x, params):
    """Pure-JAX reference for correctness checks."""
    h = x.reshape(-1, IN_FEATURES).astype(jnp.float32)
    for i, (w, b) in enumerate(params):
        h = h @ w + b
        if i < len(params) - 1:
            h = jnp.where(h >= 0, h, NEG_SLOPE * h)
    return jax.nn.softmax(h, axis=1)


if __name__ == "__main__":
    key = jax.random.PRNGKey(0)
    kp, kx = jax.random.split(key)

    params = init_params(kp)
    # input consistent with forward(): reshapable to (-1, 100*32); batch=2
    x = jax.random.normal(kx, (2, 100, 32), jnp.float32)
    ref = mlp_reference(x, params)

    # 1) strict fp32 path (bit-faithful to the reference up to fp rounding)
    out = jax.block_until_ready(mlp_forward(x, params, l1_dtype=jnp.float32))
    assert out.shape == (2, NUM_CLASSES)
    assert jnp.allclose(out, ref, atol=1e-5, rtol=1e-5), "fp32 mismatch vs reference"
    assert jnp.allclose(jnp.sum(out, axis=1), 1.0, atol=1e-5)

    # 2) device-default path (bf16 layer-1 on v5e, fp32 elsewhere)
    out_auto = jax.block_until_ready(mlp_forward(x, params))
    assert out_auto.shape == (2, NUM_CLASSES)
    assert jnp.allclose(out_auto, ref, atol=5e-2), "auto path mismatch vs reference"

    # 3) genuine bf16 x stream (x arrives bf16 from upstream -> 2 B/elem DMA)
    out_bf16 = jax.block_until_ready(mlp_forward(x.astype(jnp.bfloat16), params))
    assert out_bf16.shape == (2, NUM_CLASSES)
    assert jnp.allclose(out_bf16, ref, atol=5e-2), "bf16 mismatch vs reference"
    assert jnp.allclose(jnp.sum(out_bf16, axis=1), 1.0, atol=1e-3)

    # 4) non-divisible batch tail exercises the masked partial last block
    x_tail = jax.random.normal(kx, (19, 100, 32), jnp.float32)
    ref_tail = mlp_reference(x_tail, params)
    out_tail = jax.block_until_ready(mlp_forward(x_tail, params, l1_dtype=jnp.float32))
    assert out_tail.shape == (19, NUM_CLASSES)
    assert jnp.allclose(out_tail, ref_tail, atol=1e-5, rtol=1e-5), "tail mismatch"

    print("KERNEL_OK")
</pallas_src>

<mosaic_0001>
module attributes {stable_mosaic.version = 11 : i64} {
  func.func @mlp_kernel(%arg0: i32, %arg1: memref<16x3200xf32, #tpu.memory_space<vmem>>, %arg2: memref<3200x128xf32, #tpu.memory_space<vmem>>, %arg3: memref<1x128xf32, #tpu.memory_space<vmem>>, %arg4: memref<128x64xf32, #tpu.memory_space<vmem>>, %arg5: memref<1x64xf32, #tpu.memory_space<vmem>>, %arg6: memref<64x64xf32, #tpu.memory_space<vmem>>, %arg7: memref<1x64xf32, #tpu.memory_space<vmem>>, %arg8: memref<64x3xf32, #tpu.memory_space<vmem>>, %arg9: memref<1x3xf32, #tpu.memory_space<vmem>>, %arg10: memref<16x3xf32, #tpu.memory_space<vmem>>) attributes {dimension_semantics = [#tpu.dimension_semantics<parallel>], iteration_bounds = array<i64: 1>, scalar_prefetch = 0 : i64, scratch_operands = 0 : i64, tpu.core_type = #tpu.core_type<tc>, window_params = [{transform_indices = @transform_0, window_bounds = array<i64: 16, 3200>}, {pipeline_mode = #tpu.pipeline_mode<synchronous>, transform_indices = @transform_1, window_bounds = array<i64: 3200, 128>}, {pipeline_mode = #tpu.pipeline_mode<synchronous>, transform_indices = @transform_2, window_bounds = array<i64: 1, 128>}, {pipeline_mode = #tpu.pipeline_mode<synchronous>, transform_indices = @transform_3, window_bounds = array<i64: 128, 64>}, {pipeline_mode = #tpu.pipeline_mode<synchronous>, transform_indices = @transform_4, window_bounds = array<i64: 1, 64>}, {pipeline_mode = #tpu.pipeline_mode<synchronous>, transform_indices = @transform_5, window_bounds = array<i64: 64, 64>}, {pipeline_mode = #tpu.pipeline_mode<synchronous>, transform_indices = @transform_6, window_bounds = array<i64: 1, 64>}, {pipeline_mode = #tpu.pipeline_mode<synchronous>, transform_indices = @transform_7, window_bounds = array<i64: 64, 3>}, {pipeline_mode = #tpu.pipeline_mode<synchronous>, transform_indices = @transform_8, window_bounds = array<i64: 1, 3>}, {transform_indices = @transform_9, window_bounds = array<i64: 16, 3>}]} {
    %c0 = arith.constant 0 : index
    %c0_0 = arith.constant 0 : index
    %0 = vector.load %arg1[%c0, %c0_0] : memref<16x3200xf32, #tpu.memory_space<vmem>>, vector<16x3200xf32>
    %c0_1 = arith.constant 0 : index
    %c0_2 = arith.constant 0 : index
    %1 = vector.load %arg2[%c0_1, %c0_2] : memref<3200x128xf32, #tpu.memory_space<vmem>>, vector<3200x128xf32>
    %cst = arith.constant dense<0.000000e+00> : vector<16x128xf32>
    %2 = tpu.matmul %0, %1, %cst {dimension_numbers = #tpu.dot_dimension_numbers<[1], [0], [0], [1], [0, 0, 1, 1], [], []>} : vector<16x3200xf32>, vector<3200x128xf32>, vector<16x128xf32> -> vector<16x128xf32>
    %c0_3 = arith.constant 0 : index
    %c0_4 = arith.constant 0 : index
    %3 = vector.load %arg3[%c0_3, %c0_4] : memref<1x128xf32, #tpu.memory_space<vmem>>, vector<1x128xf32>
    %4 = vector.broadcast %3 : vector<1x128xf32> to vector<16x128xf32>
    %5 = arith.addf %2, %4 : vector<16x128xf32>
    %cst_5 = arith.constant 0.000000e+00 : f32
    %6 = vector.broadcast %cst_5 : f32 to vector<16x128xf32>
    %7 = arith.cmpf oge, %5, %6 : vector<16x128xf32>
    %cst_6 = arith.constant 0.00999999977 : f32
    %8 = vector.broadcast %cst_6 : f32 to vector<16x128xf32>
    %9 = arith.mulf %8, %5 : vector<16x128xf32>
    %10 = arith.select %7, %5, %9 : vector<16x128xi1>, vector<16x128xf32>
    %c0_7 = arith.constant 0 : index
    %c0_8 = arith.constant 0 : index
    %11 = vector.load %arg4[%c0_7, %c0_8] : memref<128x64xf32, #tpu.memory_space<vmem>>, vector<128x64xf32>
    %cst_9 = arith.constant dense<0.000000e+00> : vector<16x64xf32>
    %12 = tpu.matmul %10, %11, %cst_9 {dimension_numbers = #tpu.dot_dimension_numbers<[1], [0], [0], [1], [0, 0, 1, 1], [], []>} : vector<16x128xf32>, vector<128x64xf32>, vector<16x64xf32> -> vector<16x64xf32>
    %c0_10 = arith.constant 0 : index
    %c0_11 = arith.constant 0 : index
    %13 = vector.load %arg5[%c0_10, %c0_11] : memref<1x64xf32, #tpu.memory_space<vmem>>, vector<1x64xf32>
    %14 = vector.broadcast %13 : vector<1x64xf32> to vector<16x64xf32>
    %15 = arith.addf %12, %14 : vector<16x64xf32>
    %cst_12 = arith.constant 0.000000e+00 : f32
    %16 = vector.broadcast %cst_12 : f32 to vector<16x64xf32>
    %17 = arith.cmpf oge, %15, %16 : vector<16x64xf32>
    %cst_13 = arith.constant 0.00999999977 : f32
    %18 = vector.broadcast %cst_13 : f32 to vector<16x64xf32>
    %19 = arith.mulf %18, %15 : vector<16x64xf32>
    %20 = arith.select %17, %15, %19 : vector<16x64xi1>, vector<16x64xf32>
    %c0_14 = arith.constant 0 : index
    %c0_15 = arith.constant 0 : index
    %21 = vector.load %arg6[%c0_14, %c0_15] : memref<64x64xf32, #tpu.memory_space<vmem>>, vector<64x64xf32>
    %cst_16 = arith.constant dense<0.000000e+00> : vector<16x64xf32>
    %22 = tpu.matmul %20, %21, %cst_16 {dimension_numbers = #tpu.dot_dimension_numbers<[1], [0], [0], [1], [0, 0, 1, 1], [], []>} : vector<16x64xf32>, vector<64x64xf32>, vector<16x64xf32> -> vector<16x64xf32>
    %c0_17 = arith.constant 0 : index
    %c0_18 = arith.constant 0 : index
    %23 = vector.load %arg7[%c0_17, %c0_18] : memref<1x64xf32, #tpu.memory_space<vmem>>, vector<1x64xf32>
    %24 = vector.broadcast %23 : vector<1x64xf32> to vector<16x64xf32>
    %25 = arith.addf %22, %24 : vector<16x64xf32>
    %cst_19 = arith.constant 0.000000e+00 : f32
    %26 = vector.broadcast %cst_19 : f32 to vector<16x64xf32>
    %27 = arith.cmpf oge, %25, %26 : vector<16x64xf32>
    %cst_20 = arith.constant 0.00999999977 : f32
    %28 = vector.broadcast %cst_20 : f32 to vector<16x64xf32>
    %29 = arith.mulf %28, %25 : vector<16x64xf32>
    %30 = arith.select %27, %25, %29 : vector<16x64xi1>, vector<16x64xf32>
    %c0_21 = arith.constant 0 : index
    %c0_22 = arith.constant 0 : index
    %31 = vector.load %arg8[%c0_21, %c0_22] : memref<64x3xf32, #tpu.memory_space<vmem>>, vector<64x3xf32>
    %cst_23 = arith.constant dense<0.000000e+00> : vector<16x3xf32>
    %32 = tpu.matmul %30, %31, %cst_23 {dimension_numbers = #tpu.dot_dimension_numbers<[1], [0], [0], [1], [0, 0, 1, 1], [], []>} : vector<16x64xf32>, vector<64x3xf32>, vector<16x3xf32> -> vector<16x3xf32>
    %c0_24 = arith.constant 0 : index
    %c0_25 = arith.constant 0 : index
    %33 = vector.load %arg9[%c0_24, %c0_25] : memref<1x3xf32, #tpu.memory_space<vmem>>, vector<1x3xf32>
    %34 = vector.broadcast %33 : vector<1x3xf32> to vector<16x3xf32>
    %35 = arith.addf %32, %34 : vector<16x3xf32>
    %c16_i32 = arith.constant 16 : i32
    %36 = arith.muli %arg0, %c16_i32 : i32
    %37 = tpu.iota {dimensions = array<i32: 0>} : vector<16x1xi32>
    %38 = vector.broadcast %36 : i32 to vector<16x1xi32>
    %39 = arith.addi %38, %37 : vector<16x1xi32>
    %c2_i32 = arith.constant 2 : i32
    %40 = vector.broadcast %c2_i32 : i32 to vector<16x1xi32>
    %41 = arith.cmpi slt, %39, %40 : vector<16x1xi32>
    %cst_26 = arith.constant 0.000000e+00 : f32
    %42 = vector.shape_cast %41 : vector<16x1xi1> to vector<16x1xi1>
    %43 = vector.broadcast %42 : vector<16x1xi1> to vector<16x3xi1>
    %44 = vector.broadcast %cst_26 : f32 to vector<16x3xf32>
    %45 = arith.select %43, %35, %44 : vector<16x3xi1>, vector<16x3xf32>
    %cst_27 = arith.constant dense<0xFF800000> : vector<16xf32>
    %46 = vector.multi_reduction <maximumf>, %45, %cst_27 [1] : vector<16x3xf32> to vector<16xf32>
    %47 = vector.shape_cast %46 : vector<16xf32> to vector<16x1xf32>
    %48 = vector.broadcast %47 : vector<16x1xf32> to vector<16x3xf32>
    %49 = arith.subf %45, %48 : vector<16x3xf32>
    %50 = math.exp %49 : vector<16x3xf32>
    %cst_28 = arith.constant dense<0.000000e+00> : vector<16xf32>
    %51 = vector.multi_reduction <add>, %50, %cst_28 [1] : vector<16x3xf32> to vector<16xf32>
    %52 = vector.shape_cast %51 : vector<16xf32> to vector<16x1xf32>
    %53 = vector.broadcast %52 : vector<16x1xf32> to vector<16x3xf32>
    %54 = arith.divf %50, %53 : vector<16x3xf32>
    %c0_29 = arith.constant 0 : index
    %c0_30 = arith.constant 0 : index
    %55 = vector.load %arg10[%c0_29, %c0_30] : memref<16x3xf32, #tpu.memory_space<vmem>>, vector<16x3xf32>
    tpu.vector_store %arg10[%c0_29, %c0_30], %54 {strides = array<i32>} : memref<16x3xf32, #tpu.memory_space<vmem>>, vector<16x3xf32>,
    return
  }
  func.func @transform_0(%arg0: i32) -> (i32, i32) {
    %c0_i32 = arith.constant 0 : i32
    %c0_i32_0 = arith.constant 0 : i32
    return %arg0, %c0_i32 : i32, i32
  }
  func.func @transform_1(%arg0: i32) -> (i32, i32) {
    %c0_i32 = arith.constant 0 : i32
    %c0_i32_0 = arith.constant 0 : i32
    %c0_i32_1 = arith.constant 0 : i32
    return %c0_i32, %c0_i32_0 : i32, i32
  }
  func.func @transform_2(%arg0: i32) -> (i32, i32) {
    %c0_i32 = arith.constant 0 : i32
    %c0_i32_0 = arith.constant 0 : i32
    %c0_i32_1 = arith.constant 0 : i32
    return %c0_i32, %c0_i32_0 : i32, i32
  }
  func.func @transform_3(%arg0: i32) -> (i32, i32) {
    %c0_i32 = arith.constant 0 : i32
    %c0_i32_0 = arith.constant 0 : i32
    %c0_i32_1 = arith.constant 0 : i32
    return %c0_i32, %c0_i32_0 : i32, i32
  }
  func.func @transform_4(%arg0: i32) -> (i32, i32) {
    %c0_i32 = arith.constant 0 : i32
    %c0_i32_0 = arith.constant 0 : i32
    %c0_i32_1 = arith.constant 0 : i32
    return %c0_i32, %c0_i32_0 : i32, i32
  }
  func.func @transform_5(%arg0: i32) -> (i32, i32) {
    %c0_i32 = arith.constant 0 : i32
    %c0_i32_0 = arith.constant 0 : i32
    %c0_i32_1 = arith.constant 0 : i32
    return %c0_i32, %c0_i32_0 : i32, i32
  }
  func.func @transform_6(%arg0: i32) -> (i32, i32) {
    %c0_i32 = arith.constant 0 : i32
    %c0_i32_0 = arith.constant 0 : i32
    %c0_i32_1 = arith.constant 0 : i32
    return %c0_i32, %c0_i32_0 : i32, i32
  }
  func.func @transform_7(%arg0: i32) -> (i32, i32) {
    %c0_i32 = arith.constant 0 : i32
    %c0_i32_0 = arith.constant 0 : i32
    %c0_i32_1 = arith.constant 0 : i32
    return %c0_i32, %c0_i32_0 : i32, i32
  }
  func.func @transform_8(%arg0: i32) -> (i32, i32) {
    %c0_i32 = arith.constant 0 : i32
    %c0_i32_0 = arith.constant 0 : i32
    %c0_i32_1 = arith.constant 0 : i32
    return %c0_i32, %c0_i32_0 : i32, i32
  }
  func.func @transform_9(%arg0: i32) -> (i32, i32) {
    %c0_i32 = arith.constant 0 : i32
    %c0_i32_0 = arith.constant 0 : i32
    return %arg0, %c0_i32 : i32, i32
  }
}

</mosaic_0001>

<bundles_post_ra>
// kernel: tpu_custom_call.1
= control target key start
LH: loop header
LB: loop body
LE: loop exit
PB: predicated region body
PF: predicated region fallthrough
CT: control target
= control target key end

     0   :  { %14 = vsyncpa [#allocation3], 0  ;;  %s2093_s0 = inlined_call_operand.hbm [shape: f32[2,3200], index: 0, kind: input, shape index: {}]   ;;  %s2094_s1 = inlined_call_operand.hbm [shape: f32[3200,128], index: 1, kind: input, shape index: {}]   ;;  %s2095_s2 = inlined_call_operand.hbm [shape: f32[1,128], index: 2, kind: input, shape index: {}]   ;;  %s2096_s3 = inlined_call_operand.vmem [shape: f32[128,64], index: 3, kind: input, shape index: {}]   ;;  %s2097_s4 = inlined_call_operand.hbm [shape: f32[1,64], index: 4, kind: input, shape index: {}]   ;;  %s2098_s5 = inlined_call_operand.hbm [shape: f32[64,64], index: 5, kind: input, shape index: {}]   ;;  %s2099_s6 = inlined_call_operand.hbm [shape: f32[1,64], index: 6, kind: input, shape index: {}]   ;;  %s2100_s7 = inlined_call_operand.vmem [shape: f32[64,3], index: 7, kind: input, shape index: {}]   ;;  %s2101_s8 = inlined_call_operand.hbm [shape: f32[1,3], index: 8, kind: input, shape index: {}]   ;;  %s2102_s9 = inlined_call_operand.hbm [shape: f32[2,3], index: 9, kind: output, shape index: {}]  }
   0x1   :  { %15 = vsyncpa [#allocation6], 0 }
   0x2   :  { %16 = vsyncpa [#allocation9], 0 }
   0x3   :  { %17 = vsyncpa [#allocation12], 0 }
   0x4   :  { %18 = vsyncpa [#allocation4], 0  ;;  %s36_s11 = sshll.u32 %s2094_s1, 4  ;;  %s37_s11 = int_to_ptr.hbm [resolvable:$true] %s36_s11 }
   0x5   :  { %22 = vsyncadd [#allocation3], 5600  ;;  %s1853_s12 = smov [#allocation5]   ;;  %s63_s16 = sshll.u32 %s2097_s4, 4  ;;  %s64_s16 = int_to_ptr.hbm [resolvable:$true] %s63_s16 }
   0x6   :  { %s38_s13 = sshll.u32 %s1853_s12, 4  ;;  %s1854_s17 = smov 128   ;;  %s39_s13 = int_to_ptr.vmem [resolvable:$true] %s38_s13 }
   0x7   :  { %s1855_s18 = smov 8   ;;  %s1856_s19 = smov [#allocation8]  }
   0x8   :  { %44 = dma.hbm_to_vmem [thread:$0]  %s37_s11, 51200, %s39_s13, [#allocation6], %s1854_s17, %s1854_s17, %s1855_s18  }
   0x9   :  { %s65_s20 = sshll.u32 %s1856_s19, 4  ;;  %s87_s22 = sshll.u32 %s2099_s6, 4  ;;  %s66_s20 = int_to_ptr.vmem [resolvable:$true] %s65_s20  ;;  %s88_s22 = int_to_ptr.hbm [resolvable:$true] %s87_s22 }
   0xa   :  { %68 = dma.hbm_to_vmem [thread:$0]  %s64_s16, 16, %s66_s20, [#allocation9]  }
   0xb   :  { %s23_s4 = sshll.u32 %s2093_s0, 4  ;;  %s1857_s25 = smov [#allocation11]   ;;  %s24_s4 = int_to_ptr.hbm [resolvable:$true] %s23_s4 }
   0xc   :  { %s89_s26 = sshll.u32 %s1857_s25, 4  ;;  %s1858_s27 = smov [#allocation2]   ;;  %s90_s26 = int_to_ptr.vmem [resolvable:$true] %s89_s26 }
   0xd   :  { %92 = dma.hbm_to_vmem [thread:$0]  %s88_s22, 16, %s90_s26, [#allocation12]  }
   0xe   :  { %s25_s28 = sshll.u32 %s1858_s27, 4  ;;  %s1859_s29 = smov 800   ;;  %s26_s28 = int_to_ptr.vmem [resolvable:$true] %s25_s28 }
   0xf   :  { %s1860_s30 = smov 50   ;;  %s50_s11 = sshll.u32 %s2095_s2, 4  ;;  %s51_s11 = int_to_ptr.hbm [resolvable:$true] %s50_s11 }
  0x10   :  { %31 = dma.hbm_to_vmem [thread:$0]  %s24_s4, 800, %s26_s28, [#allocation3], %s1859_s29, %s1859_s29, %s1860_s30  }
  0x11   :  { %s1861_s12 = smov [#allocation7]   ;;  %s73_s15 = sshll.u32 %s2098_s5, 4  ;;  %s74_s15 = int_to_ptr.hbm [resolvable:$true] %s73_s15 }
  0x12   :  { %s52_s13 = sshll.u32 %s1861_s12, 4  ;;  %s1862_s16 = smov [#allocation10]   ;;  %s53_s13 = int_to_ptr.vmem [resolvable:$true] %s52_s13 }
  0x13   :  { %55 = dma.hbm_to_vmem [thread:$0]  %s51_s11, 16, %s53_s13, [#allocation6]  }
  0x14   :  { %s75_s19 = sshll.u32 %s1862_s16, 4  ;;  %s100_s1 = sshll.u32 %s2101_s8, 4  ;;  %s76_s19 = int_to_ptr.vmem [resolvable:$true] %s75_s19  ;;  %s101_s1 = int_to_ptr.hbm [resolvable:$true] %s100_s1 }
  0x15   :  { %81 = dma.hbm_to_vmem [thread:$0]  %s74_s15, 1024, %s76_s19, [#allocation9], %s1854_s17, %s1854_s17, %s1855_s18  }
  0x16   :  { %s1863_s2 = smov [#allocation13]  }
  0x17   :  { %s102_s22 = sshll.u32 %s1863_s2, 4  ;;  %s103_s22 = int_to_ptr.vmem [resolvable:$true] %s102_s22 }
  0x18   :  { %105 = dma.hbm_to_vmem [thread:$0]  %s101_s1, 16, %s103_s22, [#allocation12]  }
  0x19   :  { %1843 = dma.done.wait [#allocation3], 6400  }
  0x1a   :  { %1844 = vsyncadd [#allocation3], 4294960896 }
  0x1b   :  { %1845 = dma.done.wait [#allocation6], 51216  }
  0x1c   :  { %1846 = vsyncadd [#allocation6], 4294916080 }
  0x1d   :  { %1847 = dma.done.wait [#allocation9], 1040  }
  0x1e   :  { %1848 = vsyncadd [#allocation9], 4294966256 }
  0x1f   :  { %1849 = dma.done.wait [#allocation12], 32  }
  0x20   :  { %1850 = vsyncadd [#allocation12], 4294967264  ;;  %v205_v0 = vld [vmem:[#allocation5 + $0x78] sm:$0xff]  ;;  %v204_v2 = vld [vmem:[#allocation5 + $0x70] sm:$0xff]  ;;  %vm1455_vm3 = vcmask 523264   ;;  %vm1547_vm8 = vcmask 23552  }
  0x21   :  { %v237_v1 = vld [vmem:[#allocation5 + $0x178] sm:$0xff]  ;;  %813 = vmatpush.msra.mxu0 %v205_v0  ;;  %v236_v4 = vld [vmem:[#allocation5 + $0x170] sm:$0xff]  ;;  %v203_v6 = vld [vmem:[#allocation5 + $0x68] sm:$0xff] }
  0x22   :  { %859 = vmatpush.msra.mxu2 %v237_v1  ;;  %v221_v3 = vld [vmem:[#allocation5 + $0xf8] sm:$0xff]  ;;  %v220_v7 = vld [vmem:[#allocation5 + $0xf0] sm:$0xff]  ;;  %v235_v8 = vld [vmem:[#allocation5 + $0x168] sm:$0xff] }
  0x23   :  { %v253_v5 = vld [vmem:[#allocation5 + $0x1f8] sm:$0xff]  ;;  %836 = vmatpush.msra.mxu1 %v221_v3  ;;  %814 = vmatpush.msra.mxu0 %v204_v2  ;;  %v252_v9 = vld [vmem:[#allocation5 + $0x1f0] sm:$0xff]  ;;  %v219_v10 = vld [vmem:[#allocation5 + $0xe8] sm:$0xff] }
  0x24   :  { %882 = vmatpush.msra.mxu3 %v253_v5  ;;  %860 = vmatpush.msra.mxu2 %v236_v4  ;;  %v202_v11 = vld [vmem:[#allocation5 + $0x60] sm:$0xff]  ;;  %v251_v13 = vld [vmem:[#allocation5 + $0x1e8] sm:$0xff]  ;;  %v201_v16 = vld [vmem:[#allocation5 + $0x58] sm:$0xff] }
  0x25   :  { %837 = vmatpush.msra.mxu1 %v220_v7  ;;  %v234_v12 = vld [vmem:[#allocation5 + $0x160] sm:$0xff]  ;;  %815 = vmatpush.msra.mxu0 %v203_v6  ;;  %v233_v17 = vld [vmem:[#allocation5 + $0x158] sm:$0xff]  ;;  %v200_v20 = vld [vmem:[#allocation5 + $0x50] sm:$0xff] }
  0x26   :  { %883 = vmatpush.msra.mxu3 %v252_v9  ;;  %861 = vmatpush.msra.mxu2 %v235_v8  ;;  %v218_v14 = vld [vmem:[#allocation5 + $0xe0] sm:$0xff]  ;;  %v217_v18 = vld [vmem:[#allocation5 + $0xd8] sm:$0xff]  ;;  %v232_v21 = vld [vmem:[#allocation5 + $0x150] sm:$0xff] }
  0x27   :  { %v250_v15 = vld [vmem:[#allocation5 + $0x1e0] sm:$0xff]  ;;  %838 = vmatpush.msra.mxu1 %v219_v10  ;;  %816 = vmatpush.msra.mxu0 %v202_v11  ;;  %v249_v19 = vld [vmem:[#allocation5 + $0x1d8] sm:$0xff]  ;;  %v216_v22 = vld [vmem:[#allocation5 + $0xd0] sm:$0xff] }
  0x28   :  { %884 = vmatpush.msra.mxu3 %v251_v13  ;;  %862 = vmatpush.msra.mxu2 %v234_v12  ;;  %v248_v23 = vld [vmem:[#allocation5 + $0x1d0] sm:$0xff]  ;;  %v199_v24 = vld [vmem:[#allocation5 + $0x48] sm:$0xff]  ;;  %v198_v28 = vld [vmem:[#allocation5 + $0x40] sm:$0xff] }
  0x29   :  { %839 = vmatpush.msra.mxu1 %v218_v14  ;;  %817 = vmatpush.msra.mxu0 %v201_v16  ;;  %v231_v25 = vld [vmem:[#allocation5 + $0x148] sm:$0xff]  ;;  %v230_v29 = vld [vmem:[#allocation5 + $0x140] sm:$0xff]  ;;  %v197_v32 = vld [vmem:[#allocation5 + $0x38] sm:$0xff] }
  0x2a   :  { %885 = vmatpush.msra.mxu3 %v250_v15  ;;  %863 = vmatpush.msra.mxu2 %v233_v17  ;;  %v215_v26 = vld [vmem:[#allocation5 + $0xc8] sm:$0xff]  ;;  %v214_v30 = vld [vmem:[#allocation5 + $0xc0] sm:$0xff]  ;;  %v229_v33 = vld [vmem:[#allocation5 + $0x138] sm:$0xff] }
  0x2b   :  { %840 = vmatpush.msra.mxu1 %v217_v18  ;;  %818 = vmatpush.msra.mxu0 %v200_v20  ;;  %v247_v27 = vld [vmem:[#allocation5 + $0x1c8] sm:$0xff]  ;;  %v246_v31 = vld [vmem:[#allocation5 + $0x1c0] sm:$0xff]  ;;  %v213_v34 = vld [vmem:[#allocation5 + $0xb8] sm:$0xff] }
  0x2c   :  { %886 = vmatpush.msra.mxu3 %v249_v19  ;;  %864 = vmatpush.msra.mxu2 %v232_v21  ;;  %v245_v35 = vld [vmem:[#allocation5 + $0x1b8] sm:$0xff]  ;;  %v196_v36 = vld [vmem:[#allocation5 + $0x30] sm:$0xff]  ;;  %v195_v40 = vld [vmem:[#allocation5 + $0x28] sm:$0xff] }
  0x2d   :  { %841 = vmatpush.msra.mxu1 %v216_v22  ;;  %819 = vmatpush.msra.mxu0 %v199_v24  ;;  %v228_v37 = vld [vmem:[#allocation5 + $0x130] sm:$0xff]  ;;  %v227_v41 = vld [vmem:[#allocation5 + $0x128] sm:$0xff]  ;;  %v194_v44 = vld [vmem:[#allocation5 + $0x20] sm:$0xff] }
  0x2e   :  { %887 = vmatpush.msra.mxu3 %v248_v23  ;;  %865 = vmatpush.msra.mxu2 %v231_v25  ;;  %v212_v38 = vld [vmem:[#allocation5 + $0xb0] sm:$0xff]  ;;  %v211_v42 = vld [vmem:[#allocation5 + $0xa8] sm:$0xff]  ;;  %v226_v45 = vld [vmem:[#allocation5 + $0x120] sm:$0xff] }
  0x2f   :  { %842 = vmatpush.msra.mxu1 %v215_v26  ;;  %820 = vmatpush.msra.mxu0 %v198_v28  ;;  %v244_v39 = vld [vmem:[#allocation5 + $0x1b0] sm:$0xff]  ;;  %v243_v43 = vld [vmem:[#allocation5 + $0x1a8] sm:$0xff]  ;;  %v210_v46 = vld [vmem:[#allocation5 + $0xa0] sm:$0xff] }
  0x30   :  { %888 = vmatpush.msra.mxu3 %v247_v27  ;;  %866 = vmatpush.msra.mxu2 %v230_v29  ;;  %v242_v47 = vld [vmem:[#allocation5 + $0x1a0] sm:$0xff]  ;;  %v193_v48 = vld [vmem:[#allocation5 + $0x18] sm:$0xff]  ;;  %v192_v52 = vld [vmem:[#allocation5 + $0x10] sm:$0xff] }
  0x31   :  { %843 = vmatpush.msra.mxu1 %v214_v30  ;;  %821 = vmatpush.msra.mxu0 %v197_v32  ;;  %v225_v49 = vld [vmem:[#allocation5 + $0x118] sm:$0xff]  ;;  %v224_v53 = vld [vmem:[#allocation5 + $0x110] sm:$0xff]  ;;  %v191_v56 = vld [vmem:[#allocation5 + $0x8] sm:$0xff] }
  0x32   :  { %889 = vmatpush.msra.mxu3 %v246_v31  ;;  %867 = vmatpush.msra.mxu2 %v229_v33  ;;  %v209_v50 = vld [vmem:[#allocation5 + $0x98] sm:$0xff]  ;;  %v208_v54 = vld [vmem:[#allocation5 + $0x90] sm:$0xff]  ;;  %v223_v57 = vld [vmem:[#allocation5 + $0x108] sm:$0xff] }
  0x33   :  { %844 = vmatpush.msra.mxu1 %v213_v34  ;;  %822 = vmatpush.msra.mxu0 %v196_v36  ;;  %v241_v51 = vld [vmem:[#allocation5 + $0x198] sm:$0xff]  ;;  %v240_v55 = vld [vmem:[#allocation5 + $0x190] sm:$0xff]  ;;  %v207_v58 = vld [vmem:[#allocation5 + $0x88] sm:$0xff] }
  0x34   :  { %890 = vmatpush.msra.mxu3 %v245_v35  ;;  %868 = vmatpush.msra.mxu2 %v228_v37  ;;  %v239_v59 = vld [vmem:[#allocation5 + $0x188] sm:$0xff]  ;;  %v190_v60 = vld [vmem:[#allocation5] sm:$0xff]  ;;  %v269_v62 = vld [vmem:[#allocation5 + $0x278] sm:$0xff] }
  0x35   :  { %845 = vmatpush.msra.mxu1 %v212_v38  ;;  %823 = vmatpush.msra.mxu0 %v195_v40  ;;  %v222_v61 = vld [vmem:[#allocation5 + $0x100] sm:$0xff]  ;;  %v301_v63 = vld [vmem:[#allocation5 + $0x378] sm:$0xff]  ;;  %v268_v2 = vld [vmem:[#allocation5 + $0x270] sm:$0xff] }
  0x36   :  { %891 = vmatpush.msra.mxu3 %v244_v39  ;;  %869 = vmatpush.msra.mxu2 %v227_v41  ;;  %v206_v0 = vld [vmem:[#allocation5 + $0x80] sm:$0xff]  ;;  %v285_v3 = vld [vmem:[#allocation5 + $0x2f8] sm:$0xff]  ;;  %v300_v4 = vld [vmem:[#allocation5 + $0x370] sm:$0xff] }
  0x37   :  { %846 = vmatpush.msra.mxu1 %v211_v42  ;;  %824 = vmatpush.msra.mxu0 %v194_v44  ;;  %v238_v1 = vld [vmem:[#allocation5 + $0x180] sm:$0xff]  ;;  %v317_v5 = vld [vmem:[#allocation5 + $0x3f8] sm:$0xff]  ;;  %v267_v6 = vld [vmem:[#allocation5 + $0x268] sm:$0xff] }
  0x38   :  { %892 = vmatpush.msra.mxu3 %v243_v43  ;;  %870 = vmatpush.msra.mxu2 %v226_v45  ;;  %v284_v7 = vld [vmem:[#allocation5 + $0x2f0] sm:$0xff]  ;;  %v299_v8 = vld [vmem:[#allocation5 + $0x368] sm:$0xff]  ;;  %v266_v10 = vld [vmem:[#allocation5 + $0x260] sm:$0xff] }
  0x39   :  { %847 = vmatpush.msra.mxu1 %v210_v46  ;;  %825 = vmatpush.msra.mxu0 %v193_v48  ;;  %v316_v9 = vld [vmem:[#allocation5 + $0x3f0] sm:$0xff]  ;;  %v283_v11 = vld [vmem:[#allocation5 + $0x2e8] sm:$0xff]  ;;  %v298_v12 = vld [vmem:[#allocation5 + $0x360] sm:$0xff] }
  0x3a   :  { %893 = vmatpush.msra.mxu3 %v242_v47  ;;  %871 = vmatpush.msra.mxu2 %v225_v49  ;;  %v134_v13 = vld [vmem:[#allocation2] sm:$0xff]  ;;  %v141_v14 = vld [vmem:[#allocation2 + $0x32] sm:$0xff]  ;;  %v265_v18 = vld [vmem:[#allocation5 + $0x258] sm:$0xff] }
  0x3b   :  { %848 = vmatpush.msra.mxu1 %v209_v50  ;;  %826 = vmatpush.msra.mxu0 %v192_v52  ;;  %v315_v15 = vld [vmem:[#allocation5 + $0x3e8] sm:$0xff]  ;;  %v148_v16 = vld [vmem:[#allocation2 + $0x64] sm:$0xff]  ;;  %650 = vst [vmem:[#allocation1] ss:$4 sm:$0xff] %v134_v13  ;;  %v282_v19 = vld [vmem:[#allocation5 + $0x2e0] sm:$0xff] }
  0x3c   :  { %894 = vmatpush.msra.mxu3 %v241_v51  ;;  %872 = vmatpush.msra.mxu2 %v224_v53  ;;  %v155_v17 = vld [vmem:[#allocation2 + $0x96] sm:$0xff]  ;;  %652 = vst [vmem:[#allocation1 + $0x1] ss:$4 sm:$0xff] %v141_v14  ;;  %v297_v20 = vld [vmem:[#allocation5 + $0x358] sm:$0xff]  ;;  %v264_v22 = vld [vmem:[#allocation5 + $0x250] sm:$0xff] }
  0x3d   :  { %849 = vmatpush.msra.mxu1 %v208_v54  ;;  %827 = vmatpush.msra.mxu0 %v191_v56  ;;  %v314_v21 = vld [vmem:[#allocation5 + $0x3e0] sm:$0xff]  ;;  %654 = vst [vmem:[#allocation1 + $0x2] ss:$4 sm:$0xff] %v148_v16  ;;  %v281_v23 = vld [vmem:[#allocation5 + $0x2d8] sm:$0xff]  ;;  %v296_v24 = vld [vmem:[#allocation5 + $0x350] sm:$0xff] }
  0x3e   :  { %895 = vmatpush.msra.mxu3 %v240_v55  ;;  %873 = vmatpush.msra.mxu2 %v223_v57  ;;  %656 = vst [vmem:[#allocation1 + $0x3] ss:$4 sm:$0xff] %v155_v17  ;;  %v313_v25 = vld [vmem:[#allocation5 + $0x3d8] sm:$0xff]  ;;  %v263_v26 = vld [vmem:[#allocation5 + $0x248] sm:$0xff]  ;;  %v280_v27 = vld [vmem:[#allocation5 + $0x2d0] sm:$0xff] }
  0x3f   :  { %850 = vmatpush.msra.mxu1 %v207_v58  ;;  %828 = vmatpush.msra.mxu0 %v190_v60  ;;  %v295_v28 = vld [vmem:[#allocation5 + $0x348] sm:$0xff]  ;;  %v312_v29 = vld [vmem:[#allocation5 + $0x3d0] sm:$0xff]  ;;  %v262_v30 = vld [vmem:[#allocation5 + $0x240] sm:$0xff] }
  0x40   :  { %896 = vmatpush.msra.mxu3 %v239_v59  ;;  %874 = vmatpush.msra.mxu2 %v222_v61  ;;  %v135_v31 = vld [vmem:[#allocation2 + $0x8] sm:$0xff]  ;;  %v279_v32 = vld [vmem:[#allocation5 + $0x2c8] sm:$0xff]  ;;  %v294_v33 = vld [vmem:[#allocation5 + $0x340] sm:$0xff] }
  0x41   :  { %905 = vmatpush.msrb.mxu0 %v269_v62  ;;  %851 = vmatpush.msra.mxu1 %v206_v0  ;;  %v142_v34 = vld [vmem:[#allocation2 + $0x3a] sm:$0xff]  ;;  %658 = vst [vmem:[#allocation1 + $0x20] ss:$4 sm:$0xff] %v135_v31  ;;  %v261_v36 = vld [vmem:[#allocation5 + $0x238] sm:$0xff]  ;;  %v278_v38 = vld [vmem:[#allocation5 + $0x2c0] sm:$0xff] }
  0x42   :  { %951 = vmatpush.msrb.mxu2 %v301_v63  ;;  %897 = vmatpush.msra.mxu3 %v238_v1  ;;  %v311_v35 = vld [vmem:[#allocation5 + $0x3c8] sm:$0xff]  ;;  %v149_v37 = vld [vmem:[#allocation2 + $0x6c] sm:$0xff]  ;;  %660 = vst [vmem:[#allocation1 + $0x21] ss:$4 sm:$0xff] %v142_v34  ;;  %v260_v42 = vld [vmem:[#allocation5 + $0x230] sm:$0xff] }
  0x43   :  { %906 = vmatpush.msrb.mxu0 %v268_v2  ;;  %928 = vmatpush.msrb.mxu1 %v285_v3  ;;  %v293_v39 = vld [vmem:[#allocation5 + $0x338] sm:$0xff]  ;;  %v156_v40 = vld [vmem:[#allocation2 + $0x9e] sm:$0xff]  ;;  %662 = vst [vmem:[#allocation1 + $0x22] ss:$4 sm:$0xff] %v149_v37  ;;  %v310_v41 = vld [vmem:[#allocation5 + $0x3c0] sm:$0xff] }
  0x44   :  { %952 = vmatpush.msrb.mxu2 %v300_v4  ;;  %974 = vmatpush.msrb.mxu3 %v317_v5  ;;  %v277_v43 = vld [vmem:[#allocation5 + $0x2b8] sm:$0xff]  ;;  %v292_v44 = vld [vmem:[#allocation5 + $0x330] sm:$0xff]  ;;  %v259_v46 = vld [vmem:[#allocation5 + $0x228] sm:$0xff]  ;;  %664 = vst [vmem:[#allocation1 + $0x23] ss:$4 sm:$0xff] %v156_v40 }
  0x45   :  { %907 = vmatpush.msrb.mxu0 %v267_v6  ;;  %929 = vmatpush.msrb.mxu1 %v284_v7  ;;  %v309_v45 = vld [vmem:[#allocation5 + $0x3b8] sm:$0xff]  ;;  %v276_v47 = vld [vmem:[#allocation5 + $0x2b0] sm:$0xff]  ;;  %v665_v49 = vld.sshfl [vmem:[#allocation1] sm:$0xff pattern:$0x73625140] }
  0x46   :  { %953 = vmatpush.msrb.mxu2 %v299_v8  ;;  %975 = vmatpush.msrb.mxu3 %v316_v9  ;;  %v667_v48 = vld.sshfl [vmem:[#allocation1 + $0x10] sm:$0xff pattern:$0x73625140]  ;;  %v668_v50 = vld.sshfl [vmem:[#allocation1 + $0x18] sm:$0xff pattern:$0x73625140] }
  0x47   :  { %908 = vmatpush.msrb.mxu0 %v266_v10  ;;  %930 = vmatpush.msrb.mxu1 %v283_v11  ;;  %v666_v51 = vld.sshfl [vmem:[#allocation1 + $0x8] sm:$0xff pattern:$0x73625140]  ;;  %v291_v52 = vld [vmem:[#allocation5 + $0x328] sm:$0xff]  ;;  %v258_v54 = vld [vmem:[#allocation5 + $0x220] sm:$0xff] }
  0x48   :  { %954 = vmatpush.msrb.mxu2 %v298_v12  ;;  %976 = vmatpush.msrb.mxu3 %v315_v15  ;;  %v308_v53 = vld [vmem:[#allocation5 + $0x3b0] sm:$0xff]  ;;  %v275_v55 = vld [vmem:[#allocation5 + $0x2a8] sm:$0xff]  ;;  %v290_v56 = vld [vmem:[#allocation5 + $0x320] sm:$0xff] }
  0x49   :  { %909 = vmatpush.msrb.mxu0 %v265_v18  ;;  %931 = vmatpush.msrb.mxu1 %v282_v19  ;;  %v307_v57 = vld [vmem:[#allocation5 + $0x3a8] sm:$0xff]  ;;  %v136_v58 = vld [vmem:[#allocation2 + $0x10] sm:$0xff]  ;;  %v143_v59 = vld [vmem:[#allocation2 + $0x42] sm:$0xff] }
  0x4a   :  { %955 = vmatpush.msrb.mxu2 %v297_v20  ;;  %977 = vmatpush.msrb.mxu3 %v314_v21  ;;  %v257_v60 = vld [vmem:[#allocation5 + $0x218] sm:$0xff]  ;;  %v274_v61 = vld [vmem:[#allocation5 + $0x2a0] sm:$0xff]  ;;  %673 = vst [vmem:[#allocation1] ss:$4 sm:$0xff] %v136_v58  ;;  %v137_v0 = vld [vmem:[#allocation2 + $0x18] sm:$0xff] }
  0x4b   :  { %910 = vmatpush.msrb.mxu0 %v264_v22  ;;  %932 = vmatpush.msrb.mxu1 %v281_v23  ;;  %v289_v62 = vld [vmem:[#allocation5 + $0x318] sm:$0xff]  ;;  %v306_v63 = vld [vmem:[#allocation5 + $0x3a0] sm:$0xff]  ;;  %v151_v2 = vld [vmem:[#allocation2 + $0x7c] sm:$0xff]  ;;  %674 = vst [vmem:[#allocation1 + $0x1] ss:$4 sm:$0xff] %v143_v59 }
  0x4c   :  { %956 = vmatpush.msrb.mxu2 %v296_v24  ;;  %978 = vmatpush.msrb.mxu3 %v313_v25  ;;  %v144_v1 = vld [vmem:[#allocation2 + $0x4a] sm:$0xff]  ;;  %v1945_v3 = vld.sshfl [vmem:[#allocation1 + $0x20] sm:$0xff pattern:$0x73625140]  ;;  %v256_v7 = vld [vmem:[#allocation5 + $0x210] sm:$0xff] }
  0x4d   :  { %911 = vmatpush.msrb.mxu0 %v263_v26  ;;  %933 = vmatpush.msrb.mxu1 %v280_v27  ;;  %v1947_v4 = vld.sshfl [vmem:[#allocation1 + $0x28] sm:$0xff pattern:$0x73625140]  ;;  %v1949_v5 = vld.sshfl [vmem:[#allocation1 + $0x30] sm:$0xff pattern:$0x73625140] }
  0x4e   :  { %957 = vmatpush.msrb.mxu2 %v295_v28  ;;  %979 = vmatpush.msrb.mxu3 %v312_v29  ;;  %v1951_v6 = vld.sshfl [vmem:[#allocation1 + $0x38] sm:$0xff pattern:$0x73625140]  ;;  %v273_v8 = vld [vmem:[#allocation5 + $0x298] sm:$0xff]  ;;  %v288_v10 = vld [vmem:[#allocation5 + $0x310] sm:$0xff] }
  0x4f   :  { %912 = vmatpush.msrb.mxu0 %v262_v30  ;;  %934 = vmatpush.msrb.mxu1 %v279_v32  ;;  %v158_v9 = vld [vmem:[#allocation2 + $0xae] sm:$0xff]  ;;  %677 = vst [vmem:[#allocation1 + $0x20] ss:$4 sm:$0xff] %v137_v0  ;;  %v255_v13 = vld [vmem:[#allocation5 + $0x208] sm:$0xff]  ;;  %v272_v14 = vld [vmem:[#allocation5 + $0x290] sm:$0xff] }
  0x50   :  { %958 = vmatpush.msrb.mxu2 %v294_v33  ;;  %980 = vmatpush.msrb.mxu3 %v311_v35  ;;  %v305_v11 = vld [vmem:[#allocation5 + $0x398] sm:$0xff]  ;;  %678 = vst [vmem:[#allocation1 + $0x21] ss:$4 sm:$0xff] %v144_v1  ;;  %v150_v12 = vld [vmem:[#allocation2 + $0x74] sm:$0xff]  ;;  %v304_v17 = vld [vmem:[#allocation5 + $0x390] sm:$0xff] }
  0x51   :  { %913 = vmatpush.msrb.mxu0 %v261_v36  ;;  %935 = vmatpush.msrb.mxu1 %v278_v38  ;;  %679 = vst [vmem:[#allocation1 + $0x22] ss:$4 sm:$0xff] %v151_v2  ;;  %v157_v15 = vld [vmem:[#allocation2 + $0xa6] sm:$0xff]  ;;  %v287_v16 = vld [vmem:[#allocation5 + $0x308] sm:$0xff]  ;;  %v254_v18 = vld [vmem:[#allocation5 + $0x200] sm:$0xff] }
  0x52   :  { %959 = vmatpush.msrb.mxu2 %v293_v39  ;;  %981 = vmatpush.msrb.mxu3 %v310_v41  ;;  %680 = vst [vmem:[#allocation1 + $0x23] ss:$4 sm:$0xff] %v158_v9  ;;  %v271_v19 = vld [vmem:[#allocation5 + $0x288] sm:$0xff]  ;;  %v286_v20 = vld [vmem:[#allocation5 + $0x300] sm:$0xff]  ;;  %v333_v22 = vld [vmem:[#allocation5 + $0x478] sm:$0xff] }
  0x53   :  { %914 = vmatpush.msrb.mxu0 %v260_v42  ;;  %936 = vmatpush.msrb.mxu1 %v277_v43  ;;  %675 = vst [vmem:[#allocation1 + $0x2] ss:$4 sm:$0xff] %v150_v12  ;;  %v303_v21 = vld [vmem:[#allocation5 + $0x388] sm:$0xff]  ;;  %v365_v23 = vld [vmem:[#allocation5 + $0x578] sm:$0xff]  ;;  %v270_v24 = vld [vmem:[#allocation5 + $0x280] sm:$0xff] }
  0x54   :  { %960 = vmatpush.msrb.mxu2 %v292_v44  ;;  %982 = vmatpush.msrb.mxu3 %v309_v45  ;;  %676 = vst [vmem:[#allocation1 + $0x3] ss:$4 sm:$0xff] %v157_v15  ;;  %v139_v25 = vld [vmem:[#allocation2 + $0x28] sm:$0xff]  ;;  %v302_v26 = vld [vmem:[#allocation5 + $0x380] sm:$0xff]  ;;  %v332_v27 = vld [vmem:[#allocation5 + $0x470] sm:$0xff] }
  0x55   :  { %915 = vmatpush.msrb.mxu0 %v259_v46  ;;  %937 = vmatpush.msrb.mxu1 %v276_v47  ;;  %v349_v28 = vld [vmem:[#allocation5 + $0x4f8] sm:$0xff]  ;;  %v146_v29 = vld [vmem:[#allocation2 + $0x5a] sm:$0xff]  ;;  %v330_v42 = vld [vmem:[#allocation5 + $0x460] sm:$0xff] }
  0x56   :  { %961 = vmatpush.msrb.mxu2 %v291_v52  ;;  %983 = vmatpush.msrb.mxu3 %v308_v53  ;;  %v364_v30 = vld [vmem:[#allocation5 + $0x570] sm:$0xff]  ;;  %v381_v31 = vld [vmem:[#allocation5 + $0x5f8] sm:$0xff]  ;;  %v331_v32 = vld [vmem:[#allocation5 + $0x468] sm:$0xff] }
  0x57   :  { %875 = vmatmul.f32.vlgmr.msra.gmra.mxu2 %v667_v48  ;;  %916 = vmatpush.msrb.mxu0 %v258_v54  ;;  %v153_v33 = vld [vmem:[#allocation2 + $0x8c] sm:$0xff]  ;;  %v348_v34 = vld [vmem:[#allocation5 + $0x4f0] sm:$0xff]  ;;  %v363_v35 = vld [vmem:[#allocation5 + $0x568] sm:$0xff] }
  0x58   :  { %938 = vmatpush.msrb.mxu1 %v275_v55  ;;  %962 = vmatpush.msrb.mxu2 %v290_v56  ;;  %v380_v36 = vld [vmem:[#allocation5 + $0x5f0] sm:$0xff]  ;;  %v347_v43 = vld [vmem:[#allocation5 + $0x4e8] sm:$0xff]  ;;  %v362_v44 = vld [vmem:[#allocation5 + $0x560] sm:$0xff] }
  0x59   :  { %984 = vmatpush.msrb.mxu3 %v307_v57  ;;  %829 = vmatmul.f32.vlgmr.msra.gmra.mxu0 %v665_v49  ;;  %v1953_v37 = vld.sshfl [vmem:[#allocation1 + $0x20] sm:$0xff pattern:$0x73625140]  ;;  %v1955_v38 = vld.sshfl [vmem:[#allocation1 + $0x28] sm:$0xff pattern:$0x73625140] }
  0x5a   :  { %898 = vmatmul.f32.vlgmr.msra.gmra.mxu3 %v668_v50  ;;  %917 = vmatpush.msrb.mxu0 %v257_v60  ;;  %v1957_v39 = vld.sshfl [vmem:[#allocation1 + $0x30] sm:$0xff pattern:$0x73625140]  ;;  %v1959_v40 = vld.sshfl [vmem:[#allocation1 + $0x38] sm:$0xff pattern:$0x73625140] }
  0x5b   :  { %939 = vmatpush.msrb.mxu1 %v274_v61  ;;  %963 = vmatpush.msrb.mxu2 %v289_v62  ;;  %v160_v41 = vld [vmem:[#allocation2 + $0xbe] sm:$0xff]  ;;  %693 = vst [vmem:[#allocation1 + $0x20] ss:$4 sm:$0xff] %v139_v25  ;;  %v329_v46 = vld [vmem:[#allocation5 + $0x458] sm:$0xff]  ;;  %v346_v47 = vld [vmem:[#allocation5 + $0x4e0] sm:$0xff] }
  0x5c   :  { %985 = vmatpush.msrb.mxu3 %v306_v63  ;;  %852 = vmatmul.f32.vlgmr.msra.gmra.mxu1 %v666_v51  ;;  %694 = vst [vmem:[#allocation1 + $0x21] ss:$4 sm:$0xff] %v146_v29  ;;  %v379_v45 = vld [vmem:[#allocation5 + $0x5e8] sm:$0xff]  ;;  %v361_v48 = vld [vmem:[#allocation5 + $0x558] sm:$0xff]  ;;  %v378_v49 = vld [vmem:[#allocation5 + $0x5e0] sm:$0xff] }
  0x5d   :  { %918 = vmatpush.msrb.mxu0 %v256_v7  ;;  %940 = vmatpush.msrb.mxu1 %v273_v8  ;;  %695 = vst [vmem:[#allocation1 + $0x22] ss:$4 sm:$0xff] %v153_v33  ;;  %v328_v50 = vld [vmem:[#allocation5 + $0x450] sm:$0xff]  ;;  %v345_v51 = vld [vmem:[#allocation5 + $0x4d8] sm:$0xff]  ;;  %v327_v54 = vld [vmem:[#allocation5 + $0x448] sm:$0xff] }
  0x5e   :  { %964 = vmatpush.msrb.mxu2 %v288_v10  ;;  %986 = vmatpush.msrb.mxu3 %v305_v11  ;;  %696 = vst [vmem:[#allocation1 + $0x23] ss:$4 sm:$0xff] %v160_v41  ;;  %v360_v52 = vld [vmem:[#allocation5 + $0x550] sm:$0xff]  ;;  %v377_v53 = vld [vmem:[#allocation5 + $0x5d8] sm:$0xff]  ;;  %v359_v56 = vld [vmem:[#allocation5 + $0x548] sm:$0xff] }
  0x5f   :  { %919 = vmatpush.msrb.mxu0 %v255_v13  ;;  %941 = vmatpush.msrb.mxu1 %v272_v14  ;;  %v344_v55 = vld [vmem:[#allocation5 + $0x4d0] sm:$0xff]  ;;  %v162_v57 = vld [vmem:[#allocation2 + $0xc8] sm:$0xff]  ;;  %v326_v59 = vld [vmem:[#allocation5 + $0x440] sm:$0xff] }
  0x60   :  { %965 = vmatpush.msrb.mxu2 %v287_v16  ;;  %987 = vmatpush.msrb.mxu3 %v304_v17  ;;  %v376_v58 = vld [vmem:[#allocation5 + $0x5d0] sm:$0xff]  ;;  %v343_v60 = vld [vmem:[#allocation5 + $0x4c8] sm:$0xff]  ;;  %v358_v62 = vld [vmem:[#allocation5 + $0x540] sm:$0xff] }
  0x61   :  { %920 = vmatpush.msrb.mxu0 %v254_v18  ;;  %942 = vmatpush.msrb.mxu1 %v271_v19  ;;  %v169_v61 = vld [vmem:[#allocation2 + $0xfa] sm:$0xff]  ;;  %v325_v0 = vld [vmem:[#allocation5 + $0x438] sm:$0xff]  ;;  %v342_v2 = vld [vmem:[#allocation5 + $0x4c0] sm:$0xff] }
  0x62   :  { %966 = vmatpush.msrb.mxu2 %v286_v20  ;;  %988 = vmatpush.msrb.mxu3 %v303_v21  ;;  %v375_v63 = vld [vmem:[#allocation5 + $0x5c8] sm:$0xff]  ;;  %v176_v1 = vld [vmem:[#allocation2 + $0x12c] sm:$0xff]  ;;  %v324_v14 = vld [vmem:[#allocation5 + $0x430] sm:$0xff] }
  0x63   :  { %997 = vmatpush.msra.mxu0 %v333_v22  ;;  %943 = vmatpush.msrb.mxu1 %v270_v24  ;;  %v357_v7 = vld [vmem:[#allocation5 + $0x538] sm:$0xff]  ;;  %v374_v8 = vld [vmem:[#allocation5 + $0x5c0] sm:$0xff]  ;;  %v183_v13 = vld [vmem:[#allocation2 + $0x15e] sm:$0xff] }
  0x64   :  { %1043 = vmatpush.msra.mxu2 %v365_v23  ;;  %989 = vmatpush.msrb.mxu3 %v302_v26  ;;  %v341_v15 = vld [vmem:[#allocation5 + $0x4b8] sm:$0xff]  ;;  %v356_v16 = vld [vmem:[#allocation5 + $0x530] sm:$0xff]  ;;  %v323_v18 = vld [vmem:[#allocation5 + $0x428] sm:$0xff] }
  0x65   :  { %998 = vmatpush.msra.mxu0 %v332_v27  ;;  %1020 = vmatpush.msra.mxu1 %v349_v28  ;;  %v1961_v9 = vld.sshfl [vmem:[#allocation1 + $0x20] sm:$0xff pattern:$0x73625140]  ;;  %v1963_v10 = vld.sshfl [vmem:[#allocation1 + $0x28] sm:$0xff pattern:$0x73625140] }
  0x66   :  { %1044 = vmatpush.msra.mxu2 %v364_v30  ;;  %1066 = vmatpush.msra.mxu3 %v381_v31  ;;  %v1965_v11 = vld.sshfl [vmem:[#allocation1 + $0x30] sm:$0xff pattern:$0x73625140]  ;;  %v1967_v12 = vld.sshfl [vmem:[#allocation1 + $0x38] sm:$0xff pattern:$0x73625140] }
  0x67   :  { %999 = vmatpush.msra.mxu0 %v331_v32  ;;  %1021 = vmatpush.msra.mxu1 %v348_v34  ;;  %709 = vst [vmem:[#allocation1 + $0x20] ss:$4 sm:$0xff] %v162_v57  ;;  %v373_v17 = vld [vmem:[#allocation5 + $0x5b8] sm:$0xff]  ;;  %v340_v19 = vld [vmem:[#allocation5 + $0x4b0] sm:$0xff]  ;;  %v355_v20 = vld [vmem:[#allocation5 + $0x528] sm:$0xff] }
  0x68   :  { %1045 = vmatpush.msra.mxu2 %v363_v35  ;;  %1067 = vmatpush.msra.mxu3 %v380_v36  ;;  %710 = vst [vmem:[#allocation1 + $0x21] ss:$4 sm:$0xff] %v169_v61  ;;  %v372_v21 = vld [vmem:[#allocation5 + $0x5b0] sm:$0xff]  ;;  %v322_v23 = vld [vmem:[#allocation5 + $0x420] sm:$0xff]  ;;  %v339_v24 = vld [vmem:[#allocation5 + $0x4a8] sm:$0xff] }
  0x69   :  { %1000 = vmatpush.msra.mxu0 %v330_v42  ;;  %1022 = vmatpush.msra.mxu1 %v347_v43  ;;  %711 = vst [vmem:[#allocation1 + $0x22] ss:$4 sm:$0xff] %v176_v1  ;;  %v138_v22 = vld [vmem:[#allocation2 + $0x20] sm:$0xff]  ;;  %v145_v25 = vld [vmem:[#allocation2 + $0x52] sm:$0xff]  ;;  %v321_v42 = vld [vmem:[#allocation5 + $0x418] sm:$0xff] }
  0x6a   :  { %1046 = vmatpush.msra.mxu2 %v362_v44  ;;  %1068 = vmatpush.msra.mxu3 %v379_v45  ;;  %712 = vst [vmem:[#allocation1 + $0x23] ss:$4 sm:$0xff] %v183_v13  ;;  %v354_v26 = vld [vmem:[#allocation5 + $0x520] sm:$0xff]  ;;  %v371_v27 = vld [vmem:[#allocation5 + $0x5a8] sm:$0xff]  ;;  %v152_v32 = vld [vmem:[#allocation2 + $0x84] sm:$0xff] }
  0x6b   :  { %1001 = vmatpush.msra.mxu0 %v329_v46  ;;  %1023 = vmatpush.msra.mxu1 %v346_v47  ;;  %v1969_v28 = vld.sshfl [vmem:[#allocation1] sm:$0xff pattern:$0x73625140]  ;;  %v1971_v29 = vld.sshfl [vmem:[#allocation1 + $0x8] sm:$0xff pattern:$0x73625140] }
  0x6c   :  { %1047 = vmatpush.msra.mxu2 %v361_v48  ;;  %1069 = vmatpush.msra.mxu3 %v378_v49  ;;  %v1973_v30 = vld.sshfl [vmem:[#allocation1 + $0x10] sm:$0xff pattern:$0x73625140]  ;;  %v1975_v31 = vld.sshfl [vmem:[#allocation1 + $0x18] sm:$0xff pattern:$0x73625140] }
  0x6d   :  { %1002 = vmatpush.msra.mxu0 %v328_v50  ;;  %1024 = vmatpush.msra.mxu1 %v345_v51  ;;  %689 = vst [vmem:[#allocation1] ss:$4 sm:$0xff] %v138_v22  ;;  %v159_v33 = vld [vmem:[#allocation2 + $0xb6] sm:$0xff]  ;;  %v353_v44 = vld [vmem:[#allocation5 + $0x518] sm:$0xff]  ;;  %v320_v46 = vld [vmem:[#allocation5 + $0x410] sm:$0xff] }
  0x6e   :  { %1048 = vmatpush.msra.mxu2 %v360_v52  ;;  %1070 = vmatpush.msra.mxu3 %v377_v53  ;;  %690 = vst [vmem:[#allocation1 + $0x1] ss:$4 sm:$0xff] %v145_v25  ;;  %v338_v43 = vld [vmem:[#allocation5 + $0x4a0] sm:$0xff]  ;;  %v337_v47 = vld [vmem:[#allocation5 + $0x498] sm:$0xff]  ;;  %v352_v48 = vld [vmem:[#allocation5 + $0x510] sm:$0xff] }
  0x6f   :  { %1003 = vmatpush.msra.mxu0 %v327_v54  ;;  %1025 = vmatpush.msra.mxu1 %v344_v55  ;;  %691 = vst [vmem:[#allocation1 + $0x2] ss:$4 sm:$0xff] %v152_v32  ;;  %v370_v45 = vld [vmem:[#allocation5 + $0x5a0] sm:$0xff]  ;;  %v369_v49 = vld [vmem:[#allocation5 + $0x598] sm:$0xff]  ;;  %v319_v50 = vld [vmem:[#allocation5 + $0x408] sm:$0xff] }
  0x70   :  { %1049 = vmatpush.msra.mxu2 %v359_v56  ;;  %1071 = vmatpush.msra.mxu3 %v376_v58  ;;  %692 = vst [vmem:[#allocation1 + $0x3] ss:$4 sm:$0xff] %v159_v33  ;;  %v336_v51 = vld [vmem:[#allocation5 + $0x490] sm:$0xff]  ;;  %v351_v52 = vld [vmem:[#allocation5 + $0x508] sm:$0xff]  ;;  %v140_v54 = vld [vmem:[#allocation2 + $0x30] sm:$0x3] }
  0x71   :  { %1004 = vmatpush.msra.mxu0 %v326_v59  ;;  %1026 = vmatpush.msra.mxu1 %v343_v60  ;;  %v716_v34 = vld.sshfl [vmem:[#allocation1 + $0x30] sm:$0xff pattern:$0x73625140]  ;;  %v714_v35 = vld.sshfl [vmem:[#allocation1 + $0x20] sm:$0xff pattern:$0x73625140] }
  0x72   :  { %1050 = vmatpush.msra.mxu2 %v358_v62  ;;  %1072 = vmatpush.msra.mxu3 %v375_v63  ;;  %v717_v36 = vld.sshfl [vmem:[#allocation1 + $0x38] sm:$0xff pattern:$0x73625140]  ;;  %v715_v41 = vld.sshfl [vmem:[#allocation1 + $0x28] sm:$0xff pattern:$0x73625140] }
  0x73   :  { %1005 = vmatpush.msra.mxu0 %v325_v0  ;;  %1027 = vmatpush.msra.mxu1 %v342_v2  ;;  %v368_v53 = vld [vmem:[#allocation5 + $0x590] sm:$0xff]  ;;  %v318_v56 = vld [vmem:[#allocation5 + $0x400] sm:$0xff]  ;;  %v335_v57 = vld [vmem:[#allocation5 + $0x488] sm:$0xff] }
  0x74   :  { %1051 = vmatpush.msra.mxu2 %v357_v7  ;;  %1073 = vmatpush.msra.mxu3 %v374_v8  ;;  %v147_v55 = vld [vmem:[#allocation2 + $0x62] sm:$0x3]  ;;  %v350_v58 = vld [vmem:[#allocation5 + $0x500] sm:$0xff]  ;;  %v367_v60 = vld [vmem:[#allocation5 + $0x588] sm:$0xff] }
  0x75   :  { %1006 = vmatpush.msra.mxu0 %v324_v14  ;;  %1028 = vmatpush.msra.mxu1 %v341_v15  ;;  %v154_v59 = vld [vmem:[#allocation2 + $0x94] sm:$0x3]  ;;  %v397_v61 = vld [vmem:[#allocation5 + $0x678] sm:$0xff]  ;;  %v161_v63 = vld [vmem:[#allocation2 + $0xc6] sm:$0x3] }
  0x76   :  { %1052 = vmatpush.msra.mxu2 %v356_v16  ;;  %1074 = vmatpush.msra.mxu3 %v373_v17  ;;  %v429_v62 = vld [vmem:[#allocation5 + $0x778] sm:$0xff]  ;;  %v366_v8 = vld [vmem:[#allocation5 + $0x580] sm:$0xff]  ;;  %v428_v13 = vld [vmem:[#allocation5 + $0x770] sm:$0xff] }
  0x77   :  { %1007 = vmatpush.msra.mxu0 %v323_v18  ;;  %1029 = vmatpush.msra.mxu1 %v340_v19  ;;  %v1981_v0 = vld.sshfl [vmem:[#allocation1] sm:$0xff pattern:$0x73625140]  ;;  %v1983_v1 = vld.sshfl [vmem:[#allocation1 + $0x8] sm:$0xff pattern:$0x73625140] }
  0x78   :  { %1053 = vmatpush.msra.mxu2 %v355_v20  ;;  %1075 = vmatpush.msra.mxu3 %v372_v21  ;;  %v1985_v2 = vld.sshfl [vmem:[#allocation1 + $0x10] sm:$0xff pattern:$0x73625140]  ;;  %v1987_v7 = vld.sshfl [vmem:[#allocation1 + $0x18] sm:$0xff pattern:$0x73625140] }
  0x79   :  { %1008 = vmatpush.msra.mxu0 %v322_v23  ;;  %1030 = vmatpush.msra.mxu1 %v339_v24  ;;  %705 = vst [vmem:[#allocation1] ss:$4 sm:$0xff] %v140_v54  ;;  %v445_v14 = vld [vmem:[#allocation5 + $0x7f8] sm:$0xff]  ;;  %v395_v15 = vld [vmem:[#allocation5 + $0x668] sm:$0xff]  ;;  %v412_v16 = vld [vmem:[#allocation5 + $0x6f0] sm:$0xff] }
  0x7a   :  { %1054 = vmatpush.msra.mxu2 %v354_v26  ;;  %1076 = vmatpush.msra.mxu3 %v371_v27  ;;  %706 = vst [vmem:[#allocation1 + $0x1] ss:$4 sm:$0xff] %v147_v55  ;;  %v427_v17 = vld [vmem:[#allocation5 + $0x768] sm:$0xff]  ;;  %v444_v18 = vld [vmem:[#allocation5 + $0x7f0] sm:$0xff]  ;;  %v394_v19 = vld [vmem:[#allocation5 + $0x660] sm:$0xff] }
  0x7b   :  { %878 = vmatmul.f32.gmra.mxu2 %v716_v34  ;;  %832 = vmatmul.f32.gmra.mxu0 %v714_v35  ;;  %707 = vst [vmem:[#allocation1 + $0x2] ss:$4 sm:$0xff] %v154_v59  ;;  %v411_v20 = vld [vmem:[#allocation5 + $0x6e8] sm:$0xff]  ;;  %v426_v21 = vld [vmem:[#allocation5 + $0x760] sm:$0xff]  ;;  %v393_v26 = vld [vmem:[#allocation5 + $0x658] sm:$0xff] }
  0x7c   :  { %901 = vmatmul.f32.gmra.mxu3 %v717_v36  ;;  %855 = vmatmul.f32.gmra.mxu1 %v715_v41  ;;  %708 = vst [vmem:[#allocation1 + $0x3] ss:$4 sm:$0xff] %v161_v63  ;;  %v171_v22 = vld [vmem:[#allocation2 + $0x10a] sm:$0xff]  ;;  %v443_v23 = vld [vmem:[#allocation5 + $0x7e8] sm:$0xff]  ;;  %v170_v35 = vld [vmem:[#allocation2 + $0x102] sm:$0xff] }
  0x7d   :  { %1009 = vmatpush.msra.mxu0 %v321_v42  ;;  %1031 = vmatpush.msra.mxu1 %v338_v43  ;;  %v178_v24 = vld [vmem:[#allocation2 + $0x13c] sm:$0xff]  ;;  %v185_v25 = vld [vmem:[#allocation2 + $0x16e] sm:$0xff]  ;;  %723 = vst [vmem:[#allocation1 + $0x21] ss:$4 sm:$0xff] %v171_v22 }
  0x7e   :  { %1055 = vmatpush.msra.mxu2 %v353_v44  ;;  %1077 = vmatpush.msra.mxu3 %v370_v45  ;;  %724 = vst [vmem:[#allocation1 + $0x22] ss:$4 sm:$0xff] %v178_v24  ;;  %v410_v27 = vld [vmem:[#allocation5 + $0x6e0] sm:$0xff]  ;;  %v425_v33 = vld [vmem:[#allocation5 + $0x758] sm:$0xff]  ;;  %v392_v36 = vld [vmem:[#allocation5 + $0x650] sm:$0xff] }
  0x7f   :  { %1010 = vmatpush.msra.mxu0 %v320_v46  ;;  %1032 = vmatpush.msra.mxu1 %v337_v47  ;;  %v163_v32 = vld [vmem:[#allocation2 + $0xd0] sm:$0xff]  ;;  %725 = vst [vmem:[#allocation1 + $0x23] ss:$4 sm:$0xff] %v185_v25  ;;  %v409_v41 = vld [vmem:[#allocation5 + $0x6d8] sm:$0xff]  ;;  %v424_v43 = vld [vmem:[#allocation5 + $0x750] sm:$0xff] }
  0x80   :  { %1056 = vmatpush.msra.mxu2 %v352_v48  ;;  %1078 = vmatpush.msra.mxu3 %v369_v49  ;;  %v442_v34 = vld [vmem:[#allocation5 + $0x7e0] sm:$0xff]  ;;  %v441_v44 = vld [vmem:[#allocation5 + $0x7d8] sm:$0xff]  ;;  %v391_v46 = vld [vmem:[#allocation5 + $0x648] sm:$0xff] }
  0x81   :  { %1011 = vmatpush.msra.mxu0 %v319_v50  ;;  %1033 = vmatpush.msra.mxu1 %v336_v51  ;;  %v177_v42 = vld [vmem:[#allocation2 + $0x134] sm:$0xff]  ;;  %v408_v47 = vld [vmem:[#allocation5 + $0x6d0] sm:$0xff]  ;;  %v389_v55 = vld [vmem:[#allocation5 + $0x638] sm:$0xff] }
  0x82   :  { %1057 = vmatpush.msra.mxu2 %v351_v52  ;;  %1079 = vmatpush.msra.mxu3 %v368_v53  ;;  %v184_v48 = vld [vmem:[#allocation2 + $0x166] sm:$0xff]  ;;  %v423_v49 = vld [vmem:[#allocation5 + $0x748] sm:$0xff]  ;;  %v390_v51 = vld [vmem:[#allocation5 + $0x640] sm:$0xff] }
  0x83   :  { %967 = vmatmul.f32.vlgmr.msrb.gmra.mxu2 %v1949_v5  ;;  %921 = vmatmul.f32.vlgmr.msrb.gmra.mxu0 %v1945_v3  ;;  %v164_v3 = vld [vmem:[#allocation2 + $0xd8] sm:$0xff]  ;;  %v334_v5 = vld [vmem:[#allocation5 + $0x480] sm:$0xff]  ;;  %v440_v50 = vld [vmem:[#allocation5 + $0x7d0] sm:$0xff] }
  0x84   :  { %990 = vmatmul.f32.vlgmr.msrb.gmra.mxu3 %v1951_v6  ;;  %944 = vmatmul.f32.vlgmr.msrb.gmra.mxu1 %v1947_v4  ;;  %v396_v6 = vld [vmem:[#allocation5 + $0x670] sm:$0xff]  ;;  %v413_v4 = vld [vmem:[#allocation5 + $0x6f8] sm:$0xff]  ;;  %722 = vst [vmem:[#allocation1 + $0x20] ss:$4 sm:$0xff] %v164_v3  ;;  %v407_v52 = vld [vmem:[#allocation5 + $0x6c8] sm:$0xff] }
  0x85   :  { %1012 = vmatpush.msra.mxu0 %v318_v56  ;;  %1034 = vmatpush.msra.mxu1 %v335_v57  ;;  %v1989_v45 = vld.sshfl [vmem:[#allocation1] sm:$0xff pattern:$0x73625140]  ;;  %v422_v53 = vld [vmem:[#allocation5 + $0x740] sm:$0xff]  ;;  %v421_v57 = vld [vmem:[#allocation5 + $0x738] sm:$0xff] }
  0x86   :  { %1058 = vmatpush.msra.mxu2 %v350_v58  ;;  %1080 = vmatpush.msra.mxu3 %v367_v60  ;;  %718 = vst [vmem:[#allocation1] ss:$4 sm:$0xff] %v163_v32  ;;  %v439_v54 = vld [vmem:[#allocation5 + $0x7c8] sm:$0xff]  ;;  %v406_v56 = vld [vmem:[#allocation5 + $0x6c0] sm:$0xff]  ;;  %v388_v59 = vld [vmem:[#allocation5 + $0x630] sm:$0xff] }
  0x87   :  { %1089 = vmatpush.msrb.mxu0 %v397_v61  ;;  %1035 = vmatpush.msra.mxu1 %v334_v5  ;;  %719 = vst [vmem:[#allocation1 + $0x1] ss:$4 sm:$0xff] %v170_v35  ;;  %v438_v58 = vld [vmem:[#allocation5 + $0x7c0] sm:$0xff]  ;;  %v405_v60 = vld [vmem:[#allocation5 + $0x6b8] sm:$0xff]  ;;  %v420_v61 = vld [vmem:[#allocation5 + $0x730] sm:$0xff] }
  0x88   :  { %1135 = vmatpush.msrb.mxu2 %v429_v62  ;;  %1081 = vmatpush.msra.mxu3 %v366_v8  ;;  %720 = vst [vmem:[#allocation1 + $0x2] ss:$4 sm:$0xff] %v177_v42  ;;  %v437_v62 = vld [vmem:[#allocation5 + $0x7b8] sm:$0xff]  ;;  %v387_v63 = vld [vmem:[#allocation5 + $0x628] sm:$0xff]  ;;  %v404_v3 = vld [vmem:[#allocation5 + $0x6b0] sm:$0xff] }
  0x89   :  { %1090 = vmatpush.msrb.mxu0 %v396_v6  ;;  %1112 = vmatpush.msrb.mxu1 %v413_v4  ;;  %721 = vst [vmem:[#allocation1 + $0x3] ss:$4 sm:$0xff] %v184_v48  ;;  %v419_v5 = vld [vmem:[#allocation5 + $0x728] sm:$0xff]  ;;  %v436_v8 = vld [vmem:[#allocation5 + $0x7b0] sm:$0xff]  ;;  %v386_v6 = vld [vmem:[#allocation5 + $0x620] sm:$0xff] }
  0x8a   :  { %1136 = vmatpush.msrb.mxu2 %v428_v13  ;;  %1158 = vmatpush.msrb.mxu3 %v445_v14  ;;  %v403_v4 = vld [vmem:[#allocation5 + $0x6a8] sm:$0xff]  ;;  %v434_v22 = vld [vmem:[#allocation5 + $0x7a0] sm:$0xff]  ;;  %v401_v24 = vld [vmem:[#allocation5 + $0x698] sm:$0xff] }
  0x8b   :  { %1091 = vmatpush.msrb.mxu0 %v395_v15  ;;  %1113 = vmatpush.msrb.mxu1 %v412_v16  ;;  %v416_v25 = vld [vmem:[#allocation5 + $0x710] sm:$0xff]  ;;  %v382_v35 = vld [vmem:[#allocation5 + $0x600] sm:$0xff]  ;;  %v399_v42 = vld [vmem:[#allocation5 + $0x688] sm:$0xff] }
  0x8c   :  { %1137 = vmatpush.msrb.mxu2 %v427_v17  ;;  %1159 = vmatpush.msrb.mxu3 %v444_v18  ;;  %v418_v17 = vld [vmem:[#allocation5 + $0x720] sm:$0xff]  ;;  %v435_v18 = vld [vmem:[#allocation5 + $0x7a8] sm:$0xff]  ;;  %v400_v32 = vld [vmem:[#allocation5 + $0x690] sm:$0xff] }
  0x8d   :  { %1092 = vmatpush.msrb.mxu0 %v394_v19  ;;  %1114 = vmatpush.msrb.mxu1 %v411_v20  ;;  %v385_v19 = vld [vmem:[#allocation5 + $0x618] sm:$0xff]  ;;  %v402_v20 = vld [vmem:[#allocation5 + $0x6a0] sm:$0xff]  ;;  %v731_v48 = vld.sshfl [vmem:[#allocation1 + $0x28] sm:$0xff pattern:$0x73625140] }
  0x8e   :  { %1138 = vmatpush.msrb.mxu2 %v426_v21  ;;  %1160 = vmatpush.msrb.mxu3 %v443_v23  ;;  %v417_v21 = vld [vmem:[#allocation5 + $0x718] sm:$0xff]  ;;  %v384_v23 = vld [vmem:[#allocation5 + $0x610] sm:$0xff] }
  0x8f   :  { %1093 = vmatpush.msrb.mxu0 %v393_v26  ;;  %1115 = vmatpush.msrb.mxu1 %v410_v27  ;;  %v433_v26 = vld [vmem:[#allocation5 + $0x798] sm:$0xff]  ;;  %v383_v27 = vld [vmem:[#allocation5 + $0x608] sm:$0xff] }
  0x90   :  { %1139 = vmatpush.msrb.mxu2 %v425_v33  ;;  %1161 = vmatpush.msrb.mxu3 %v442_v34  ;;  %v726_v13 = vld.sshfl [vmem:[#allocation1] sm:$0xff pattern:$0x73625140]  ;;  %v728_v14 = vld.sshfl [vmem:[#allocation1 + $0x10] sm:$0xff pattern:$0x73625140] }
  0x91   :  { %1094 = vmatpush.msrb.mxu0 %v392_v36  ;;  %1116 = vmatpush.msrb.mxu1 %v409_v41  ;;  %v727_v15 = vld.sshfl [vmem:[#allocation1 + $0x8] sm:$0xff pattern:$0x73625140]  ;;  %v729_v16 = vld.sshfl [vmem:[#allocation1 + $0x18] sm:$0xff pattern:$0x73625140] }
  0x92   :  { %1140 = vmatpush.msrb.mxu2 %v424_v43  ;;  %1162 = vmatpush.msrb.mxu3 %v441_v44  ;;  %v415_v33 = vld [vmem:[#allocation5 + $0x708] sm:$0xff]  ;;  %v432_v34 = vld [vmem:[#allocation5 + $0x790] sm:$0xff] }
  0x93   :  { %1095 = vmatpush.msrb.mxu0 %v391_v46  ;;  %1117 = vmatpush.msrb.mxu1 %v408_v47  ;;  %v165_v36 = vld [vmem:[#allocation2 + $0xe0] sm:$0xff]  ;;  %v172_v41 = vld [vmem:[#allocation2 + $0x112] sm:$0xff]  ;;  %v493_v47 = vld [vmem:[#allocation5 + $0x978] sm:$0xff] }
  0x94   :  { %1141 = vmatpush.msrb.mxu2 %v423_v49  ;;  %1163 = vmatpush.msrb.mxu3 %v440_v50  ;;  %v179_v43 = vld [vmem:[#allocation2 + $0x144] sm:$0xff]  ;;  %v186_v44 = vld [vmem:[#allocation2 + $0x176] sm:$0xff]  ;;  %734 = vst [vmem:[#allocation1] ss:$4 sm:$0xff] %v165_v36 }
  0x95   :  { %1096 = vmatpush.msrb.mxu0 %v390_v51  ;;  %1118 = vmatpush.msrb.mxu1 %v407_v52  ;;  %v730_v46 = vld.sshfl [vmem:[#allocation1 + $0x20] sm:$0xff pattern:$0x73625140]  ;;  %735 = vst [vmem:[#allocation1 + $0x1] ss:$4 sm:$0xff] %v172_v41  ;;  %v398_v50 = vld [vmem:[#allocation5 + $0x680] sm:$0xff] }
  0x96   :  { %1142 = vmatpush.msrb.mxu2 %v422_v53  ;;  %1164 = vmatpush.msrb.mxu3 %v439_v54  ;;  %736 = vst [vmem:[#allocation1 + $0x2] ss:$4 sm:$0xff] %v179_v43  ;;  %v733_v49 = vld.sshfl [vmem:[#allocation1 + $0x38] sm:$0xff pattern:$0x73625140]  ;;  %v460_v52 = vld [vmem:[#allocation5 + $0x870] sm:$0xff] }
  0x97   :  { %1097 = vmatpush.msrb.mxu0 %v389_v55  ;;  %1119 = vmatpush.msrb.mxu1 %v406_v56  ;;  %737 = vst [vmem:[#allocation1 + $0x3] ss:$4 sm:$0xff] %v186_v44  ;;  %v430_v51 = vld [vmem:[#allocation5 + $0x780] sm:$0xff]  ;;  %v477_v53 = vld [vmem:[#allocation5 + $0x8f8] sm:$0xff]  ;;  %v492_v54 = vld [vmem:[#allocation5 + $0x970] sm:$0xff] }
  0x98   :  { %1143 = vmatpush.msrb.mxu2 %v421_v57  ;;  %1165 = vmatpush.msrb.mxu3 %v438_v58  ;;  %v509_v55 = vld [vmem:[#allocation5 + $0x9f8] sm:$0xff]  ;;  %v459_v56 = vld [vmem:[#allocation5 + $0x868] sm:$0xff]  ;;  %v476_v57 = vld [vmem:[#allocation5 + $0x8f0] sm:$0xff] }
  0x99   :  { %1098 = vmatpush.msrb.mxu0 %v388_v59  ;;  %1120 = vmatpush.msrb.mxu1 %v405_v60  ;;  %v491_v58 = vld [vmem:[#allocation5 + $0x968] sm:$0xff]  ;;  %v508_v59 = vld [vmem:[#allocation5 + $0x9f0] sm:$0xff]  ;;  %v458_v60 = vld [vmem:[#allocation5 + $0x860] sm:$0xff] }
  0x9a   :  { %1144 = vmatpush.msrb.mxu2 %v420_v61  ;;  %1166 = vmatpush.msrb.mxu3 %v437_v62  ;;  %v475_v61 = vld [vmem:[#allocation5 + $0x8e8] sm:$0xff]  ;;  %v490_v62 = vld [vmem:[#allocation5 + $0x960] sm:$0xff]  ;;  %v452_v36 = vld [vmem:[#allocation5 + $0x830] sm:$0xff] }
  0x9b   :  { %1099 = vmatpush.msrb.mxu0 %v387_v63  ;;  %1121 = vmatpush.msrb.mxu1 %v404_v3  ;;  %v507_v63 = vld [vmem:[#allocation5 + $0x9e8] sm:$0xff]  ;;  %v457_v3 = vld [vmem:[#allocation5 + $0x858] sm:$0xff] }
  0x9c   :  { %924 = vmatmul.f32.gmra.mxu0 %v726_v13  ;;  %970 = vmatmul.f32.gmra.mxu2 %v728_v14  ;;  %v473_v13 = vld [vmem:[#allocation5 + $0x8d8] sm:$0xff]  ;;  %v488_v14 = vld [vmem:[#allocation5 + $0x950] sm:$0xff]  ;;  %v451_v44 = vld [vmem:[#allocation5 + $0x828] sm:$0xff] }
  0x9d   :  { %947 = vmatmul.f32.gmra.mxu1 %v727_v15  ;;  %993 = vmatmul.f32.gmra.mxu3 %v729_v16  ;;  %v505_v15 = vld [vmem:[#allocation5 + $0x9d8] sm:$0xff] }
  0x9e   :  { %1145 = vmatpush.msrb.mxu2 %v419_v5  ;;  %1167 = vmatpush.msrb.mxu3 %v436_v8  ;;  %v474_v5 = vld [vmem:[#allocation5 + $0x8e0] sm:$0xff]  ;;  %v489_v8 = vld [vmem:[#allocation5 + $0x958] sm:$0xff]  ;;  %v742_v16 = vld.sshfl [vmem:[#allocation1] sm:$0xff pattern:$0x73625140] }
  0x9f   :  { %1100 = vmatpush.msrb.mxu0 %v386_v6  ;;  %1122 = vmatpush.msrb.mxu1 %v403_v4  ;;  %v506_v6 = vld [vmem:[#allocation5 + $0x9e0] sm:$0xff]  ;;  %v456_v4 = vld [vmem:[#allocation5 + $0x850] sm:$0xff]  ;;  %v469_v41 = vld [vmem:[#allocation5 + $0x8b8] sm:$0xff] }
  0xa0   :  { %1146 = vmatpush.msrb.mxu2 %v418_v17  ;;  %1168 = vmatpush.msrb.mxu3 %v435_v18  ;;  %v744_v17 = vld.sshfl [vmem:[#allocation1 + $0x10] sm:$0xff pattern:$0x73625140]  ;;  %v487_v18 = vld [vmem:[#allocation5 + $0x948] sm:$0xff] }
  0xa1   :  { %1101 = vmatpush.msrb.mxu0 %v385_v19  ;;  %1123 = vmatpush.msrb.mxu1 %v402_v20  ;;  %v504_v19 = vld [vmem:[#allocation5 + $0x9d0] sm:$0xff]  ;;  %v454_v20 = vld [vmem:[#allocation5 + $0x840] sm:$0xff]  ;;  %v501_v43 = vld [vmem:[#allocation5 + $0x9b8] sm:$0xff] }
  0xa2   :  { %1147 = vmatpush.msrb.mxu2 %v417_v21  ;;  %1169 = vmatpush.msrb.mxu3 %v434_v22  ;;  %v471_v21 = vld [vmem:[#allocation5 + $0x8c8] sm:$0xff]  ;;  %v486_v22 = vld [vmem:[#allocation5 + $0x940] sm:$0xff] }
  0xa3   :  { %1102 = vmatpush.msrb.mxu0 %v384_v23  ;;  %1124 = vmatpush.msrb.mxu1 %v401_v24  ;;  %v503_v23 = vld [vmem:[#allocation5 + $0x9c8] sm:$0xff]  ;;  %v453_v24 = vld [vmem:[#allocation5 + $0x838] sm:$0xff] }
  0xa4   :  { %1013 = vmatmul.f32.vlgmr.msra.gmra.mxu0 %v1969_v28  ;;  %1059 = vmatmul.f32.vlgmr.msra.gmra.mxu2 %v1973_v30  ;;  %v414_v28 = vld [vmem:[#allocation5 + $0x700] sm:$0xff]  ;;  %v431_v30 = vld [vmem:[#allocation5 + $0x788] sm:$0xff] }
  0xa5   :  { %1036 = vmatmul.f32.vlgmr.msra.gmra.mxu1 %v1971_v29  ;;  %1082 = vmatmul.f32.vlgmr.msra.gmra.mxu3 %v1975_v31  ;;  %v461_v29 = vld [vmem:[#allocation5 + $0x878] sm:$0xff] }
  0xa6   :  { %1148 = vmatpush.msrb.mxu2 %v416_v25  ;;  %1170 = vmatpush.msrb.mxu3 %v433_v26  ;;  %v732_v31 = vld.sshfl [vmem:[#allocation1 + $0x30] sm:$0xff pattern:$0x73625140]  ;;  %v470_v25 = vld [vmem:[#allocation5 + $0x8c0] sm:$0xff] }
  0xa7   :  { %1103 = vmatpush.msrb.mxu0 %v383_v27  ;;  %1125 = vmatpush.msrb.mxu1 %v400_v32  ;;  %v166_v26 = vld [vmem:[#allocation2 + $0xe8] sm:$0xff]  ;;  %v173_v27 = vld [vmem:[#allocation2 + $0x11a] sm:$0xff] }
  0xa8   :  { %1149 = vmatpush.msrb.mxu2 %v415_v33  ;;  %1171 = vmatpush.msrb.mxu3 %v432_v34  ;;  %v180_v32 = vld [vmem:[#allocation2 + $0x14c] sm:$0xff]  ;;  %738 = vst [vmem:[#allocation1 + $0x20] ss:$4 sm:$0xff] %v166_v26 }
  0xa9   :  { %1104 = vmatpush.msrb.mxu0 %v382_v35  ;;  %1126 = vmatpush.msrb.mxu1 %v399_v42  ;;  %v485_v33 = vld [vmem:[#allocation5 + $0x938] sm:$0xff]  ;;  %v502_v34 = vld [vmem:[#allocation5 + $0x9c0] sm:$0xff]  ;;  %v187_v35 = vld [vmem:[#allocation2 + $0x17e] sm:$0xff]  ;;  %739 = vst [vmem:[#allocation1 + $0x21] ss:$4 sm:$0xff] %v173_v27 }
  0xaa   :  { %1150 = vmatpush.msrb.mxu2 %v414_v28  ;;  %1172 = vmatpush.msrb.mxu3 %v431_v30  ;;  %v484_v42 = vld [vmem:[#allocation5 + $0x930] sm:$0xff]  ;;  %740 = vst [vmem:[#allocation1 + $0x22] ss:$4 sm:$0xff] %v180_v32  ;;  %v483_v28 = vld [vmem:[#allocation5 + $0x928] sm:$0xff]  ;;  %v537_v26 = vld [vmem:[#allocation5 + $0xad8] sm:$0xff] }
  0xab   :  { %1181 = vmatpush.msra.mxu0 %v461_v29  ;;  %1127 = vmatpush.msrb.mxu1 %v398_v50  ;;  %741 = vst [vmem:[#allocation1 + $0x23] ss:$4 sm:$0xff] %v187_v35  ;;  %v500_v30 = vld [vmem:[#allocation5 + $0x9b0] sm:$0xff]  ;;  %v450_v29 = vld [vmem:[#allocation5 + $0x820] sm:$0xff]  ;;  %v569_v32 = vld [vmem:[#allocation5 + $0xbd8] sm:$0xff] }
  0xac   :  { %1227 = vmatpush.msra.mxu2 %v493_v47  ;;  %1016 = vmatmul.f32.gmra.mxu0 %v730_v46  ;;  %v468_v46 = vld [vmem:[#allocation5 + $0x8b0] sm:$0xff]  ;;  %v467_v47 = vld [vmem:[#allocation5 + $0x8a8] sm:$0xff]  ;;  %v466_v50 = vld [vmem:[#allocation5 + $0x8a0] sm:$0xff] }
  0xad   :  { %1062 = vmatmul.f32.gmra.mxu2 %v732_v31  ;;  %1039 = vmatmul.f32.gmra.mxu1 %v731_v48  ;;  %v482_v31 = vld [vmem:[#allocation5 + $0x920] sm:$0xff]  ;;  %v499_v48 = vld [vmem:[#allocation5 + $0x9a8] sm:$0xff]  ;;  %v552_v27 = vld [vmem:[#allocation5 + $0xb50] sm:$0xff] }
  0xae   :  { %1085 = vmatmul.f32.gmra.mxu3 %v733_v49  ;;  %1182 = vmatpush.msra.mxu0 %v460_v52  ;;  %v449_v49 = vld [vmem:[#allocation5 + $0x818] sm:$0xff]  ;;  %v498_v52 = vld [vmem:[#allocation5 + $0x9a0] sm:$0xff]  ;;  %v551_v35 = vld [vmem:[#allocation5 + $0xb48] sm:$0xff] }
  0xaf   :  { %1173 = vmatpush.msrb.mxu3 %v430_v51  ;;  %1204 = vmatpush.msra.mxu1 %v477_v53  ;;  %v481_v51 = vld [vmem:[#allocation5 + $0x918] sm:$0xff]  ;;  %v448_v53 = vld [vmem:[#allocation5 + $0x810] sm:$0xff] }
  0xb0   :  { %1228 = vmatpush.msra.mxu2 %v492_v54  ;;  %1183 = vmatpush.msra.mxu0 %v459_v56  ;;  %v465_v54 = vld [vmem:[#allocation5 + $0x898] sm:$0xff] }
  0xb1   :  { %1250 = vmatpush.msra.mxu3 %v509_v55  ;;  %1205 = vmatpush.msra.mxu1 %v476_v57  ;;  %v480_v55 = vld [vmem:[#allocation5 + $0x910] sm:$0xff]  ;;  %v497_v56 = vld [vmem:[#allocation5 + $0x998] sm:$0xff]  ;;  %v447_v57 = vld [vmem:[#allocation5 + $0x808] sm:$0xff] }
  0xb2   :  { %1229 = vmatpush.msra.mxu2 %v491_v58  ;;  %1184 = vmatpush.msra.mxu0 %v458_v60  ;;  %v464_v58 = vld [vmem:[#allocation5 + $0x890] sm:$0xff] }
  0xb3   :  { %1251 = vmatpush.msra.mxu3 %v508_v59  ;;  %1206 = vmatpush.msra.mxu1 %v475_v61  ;;  %v479_v59 = vld [vmem:[#allocation5 + $0x908] sm:$0xff]  ;;  %v496_v60 = vld [vmem:[#allocation5 + $0x990] sm:$0xff]  ;;  %v446_v61 = vld [vmem:[#allocation5 + $0x800] sm:$0xff] }
  0xb4   :  { %1105 = vmatmul.f32.vlgmr.msrb.gmra.mxu0 %v1953_v37  ;;  %1230 = vmatpush.msra.mxu2 %v490_v62  ;;  %v455_v37 = vld [vmem:[#allocation5 + $0x848] sm:$0xff] }
  0xb5   :  { %1151 = vmatmul.f32.vlgmr.msrb.gmra.mxu2 %v1957_v39  ;;  %1128 = vmatmul.f32.vlgmr.msrb.gmra.mxu1 %v1955_v38  ;;  %v472_v39 = vld [vmem:[#allocation5 + $0x8d0] sm:$0xff]  ;;  %v463_v62 = vld [vmem:[#allocation5 + $0x888] sm:$0xff] }
  0xb6   :  { %1174 = vmatmul.f32.vlgmr.msrb.gmra.mxu3 %v1959_v40  ;;  %1185 = vmatpush.msra.mxu0 %v457_v3  ;;  %v743_v38 = vld.sshfl [vmem:[#allocation1 + $0x8] sm:$0xff pattern:$0x73625140]  ;;  %v745_v40 = vld.sshfl [vmem:[#allocation1 + $0x18] sm:$0xff pattern:$0x73625140] }
  0xb7   :  { %1252 = vmatpush.msra.mxu3 %v507_v63  ;;  %1207 = vmatpush.msra.mxu1 %v474_v5  ;;  %v478_v63 = vld [vmem:[#allocation5 + $0x900] sm:$0xff]  ;;  %v495_v3 = vld [vmem:[#allocation5 + $0x988] sm:$0xff]  ;;  %v525_v5 = vld [vmem:[#allocation5 + $0xa78] sm:$0xff] }
  0xb8   :  { %1231 = vmatpush.msra.mxu2 %v489_v8  ;;  %1186 = vmatpush.msra.mxu0 %v456_v4  ;;  %v557_v8 = vld [vmem:[#allocation5 + $0xb78] sm:$0xff]  ;;  %v494_v4 = vld [vmem:[#allocation5 + $0x980] sm:$0xff] }
  0xb9   :  { %1253 = vmatpush.msra.mxu3 %v506_v6  ;;  %1208 = vmatpush.msra.mxu1 %v473_v13  ;;  %v462_v6 = vld [vmem:[#allocation5 + $0x880] sm:$0xff]  ;;  %v524_v13 = vld [vmem:[#allocation5 + $0xa70] sm:$0xff] }
  0xba   :  { %1232 = vmatpush.msra.mxu2 %v488_v14  ;;  %1187 = vmatpush.msra.mxu0 %v455_v37  ;;  %v541_v14 = vld [vmem:[#allocation5 + $0xaf8] sm:$0xff] }
  0xbb   :  { %1254 = vmatpush.msra.mxu3 %v505_v15  ;;  %1209 = vmatpush.msra.mxu1 %v472_v39  ;;  %v556_v15 = vld [vmem:[#allocation5 + $0xb70] sm:$0xff]  ;;  %v573_v37 = vld [vmem:[#allocation5 + $0xbf8] sm:$0xff]  ;;  %v523_v39 = vld [vmem:[#allocation5 + $0xa68] sm:$0xff] }
  0xbc   :  { %1108 = vmatmul.f32.gmra.mxu0 %v742_v16  ;;  %1233 = vmatpush.msra.mxu2 %v487_v18  ;;  %v540_v16 = vld [vmem:[#allocation5 + $0xaf0] sm:$0xff]  ;;  %v571_v18 = vld [vmem:[#allocation5 + $0xbe8] sm:$0xff] }
  0xbd   :  { %1154 = vmatmul.f32.gmra.mxu2 %v744_v17  ;;  %1131 = vmatmul.f32.gmra.mxu1 %v743_v38  ;;  %v555_v17 = vld [vmem:[#allocation5 + $0xb68] sm:$0xff] }
  0xbe   :  { %1177 = vmatmul.f32.gmra.mxu3 %v745_v40  ;;  %1188 = vmatpush.msra.mxu0 %v454_v20  ;;  %v539_v38 = vld [vmem:[#allocation5 + $0xae8] sm:$0xff]  ;;  %v554_v40 = vld [vmem:[#allocation5 + $0xb60] sm:$0xff] }
  0xbf   :  { %1255 = vmatpush.msra.mxu3 %v504_v19  ;;  %1210 = vmatpush.msra.mxu1 %v471_v21  ;;  %v746_v19 = vld.sshfl [vmem:[#allocation1 + $0x20] sm:$0xff pattern:$0x73625140]  ;;  %v538_v20 = vld [vmem:[#allocation5 + $0xae0] sm:$0xff]  ;;  %v553_v21 = vld [vmem:[#allocation5 + $0xb58] sm:$0xff] }
  0xc0   :  { %1234 = vmatpush.msra.mxu2 %v486_v22  ;;  %1189 = vmatpush.msra.mxu0 %v453_v24  ;;  %v570_v22 = vld [vmem:[#allocation5 + $0xbe0] sm:$0xff] }
  0xc1   :  { %1256 = vmatpush.msra.mxu3 %v503_v23  ;;  %1211 = vmatpush.msra.mxu1 %v470_v25  ;;  %v747_v23 = vld.sshfl [vmem:[#allocation1 + $0x28] sm:$0xff pattern:$0x73625140]  ;;  %v749_v24 = vld.sshfl [vmem:[#allocation1 + $0x38] sm:$0xff pattern:$0x73625140] }
  0xc2   :  { %1235 = vmatpush.msra.mxu2 %v485_v33  ;;  %1190 = vmatpush.msra.mxu0 %v452_v36  ;;  %v520_v25 = vld [vmem:[#allocation5 + $0xa50] sm:$0xff]  ;;  %v519_v33 = vld [vmem:[#allocation5 + $0xa48] sm:$0xff] }
  0xc3   :  { %1257 = vmatpush.msra.mxu3 %v502_v34  ;;  %1212 = vmatpush.msra.mxu1 %v469_v41  ;;  %v536_v34 = vld [vmem:[#allocation5 + $0xad0] sm:$0xff]  ;;  %v518_v41 = vld [vmem:[#allocation5 + $0xa40] sm:$0xff] }
  0xc4   :  { %1236 = vmatpush.msra.mxu2 %v484_v42  ;;  %1191 = vmatpush.msra.mxu0 %v451_v44  ;;  %v568_v36 = vld [vmem:[#allocation5 + $0xbd0] sm:$0xff]  ;;  %v535_v42 = vld [vmem:[#allocation5 + $0xac8] sm:$0xff] }
  0xc5   :  { %1258 = vmatpush.msra.mxu3 %v501_v43  ;;  %1213 = vmatpush.msra.mxu1 %v468_v46  ;;  %v167_v43 = vld [vmem:[#allocation2 + $0xf0] sm:$0xff]  ;;  %v174_v44 = vld [vmem:[#allocation2 + $0x122] sm:$0xff] }
  0xc6   :  { %1237 = vmatpush.msra.mxu2 %v483_v28  ;;  %1192 = vmatpush.msra.mxu0 %v450_v29  ;;  %v181_v46 = vld [vmem:[#allocation2 + $0x154] sm:$0xff]  ;;  %v188_v29 = vld [vmem:[#allocation2 + $0x186] sm:$0xff]  ;;  %750 = vst [vmem:[#allocation1] ss:$4 sm:$0xff] %v167_v43 }
  0xc7   :  { %1259 = vmatpush.msra.mxu3 %v500_v30  ;;  %1214 = vmatpush.msra.mxu1 %v467_v47  ;;  %v550_v28 = vld [vmem:[#allocation5 + $0xb40] sm:$0xff]  ;;  %v567_v30 = vld [vmem:[#allocation5 + $0xbc8] sm:$0xff]  ;;  %v517_v47 = vld [vmem:[#allocation5 + $0xa38] sm:$0xff]  ;;  %751 = vst [vmem:[#allocation1 + $0x1] ss:$4 sm:$0xff] %v174_v44 }
  0xc8   :  { %1238 = vmatpush.msra.mxu2 %v482_v31  ;;  %1193 = vmatpush.msra.mxu0 %v449_v49  ;;  %v534_v31 = vld [vmem:[#allocation5 + $0xac0] sm:$0xff]  ;;  %752 = vst [vmem:[#allocation1 + $0x2] ss:$4 sm:$0xff] %v181_v46 }
  0xc9   :  { %1260 = vmatpush.msra.mxu3 %v499_v48  ;;  %1215 = vmatpush.msra.mxu1 %v466_v50  ;;  %v549_v48 = vld [vmem:[#allocation5 + $0xb38] sm:$0xff]  ;;  %v566_v49 = vld [vmem:[#allocation5 + $0xbc0] sm:$0xff]  ;;  %v516_v50 = vld [vmem:[#allocation5 + $0xa30] sm:$0xff]  ;;  %753 = vst [vmem:[#allocation1 + $0x3] ss:$4 sm:$0xff] %v188_v29 }
  0xca   :  { %1239 = vmatpush.msra.mxu2 %v481_v51  ;;  %1194 = vmatpush.msra.mxu0 %v448_v53  ;;  %v533_v51 = vld [vmem:[#allocation5 + $0xab8] sm:$0xff]  ;;  %v574_v43 = vld [vmem:[#allocation5 + $0xc00] sm:$0xff] }
  0xcb   :  { %1261 = vmatpush.msra.mxu3 %v498_v52  ;;  %1216 = vmatpush.msra.mxu1 %v465_v54  ;;  %v548_v52 = vld [vmem:[#allocation5 + $0xb30] sm:$0xff]  ;;  %v565_v53 = vld [vmem:[#allocation5 + $0xbb8] sm:$0xff]  ;;  %v515_v54 = vld [vmem:[#allocation5 + $0xa28] sm:$0xff] }
  0xcc   :  { %1240 = vmatpush.msra.mxu2 %v480_v55  ;;  %1195 = vmatpush.msra.mxu0 %v447_v57  ;;  %v532_v55 = vld [vmem:[#allocation5 + $0xab0] sm:$0xff] }
  0xcd   :  { %1262 = vmatpush.msra.mxu3 %v497_v56  ;;  %1217 = vmatpush.msra.mxu1 %v464_v58  ;;  %v547_v56 = vld [vmem:[#allocation5 + $0xb28] sm:$0xff]  ;;  %v564_v57 = vld [vmem:[#allocation5 + $0xbb0] sm:$0xff]  ;;  %v514_v58 = vld [vmem:[#allocation5 + $0xa20] sm:$0xff] }
  0xce   :  { %1241 = vmatpush.msra.mxu2 %v479_v59  ;;  %1196 = vmatpush.msra.mxu0 %v446_v61  ;;  %v531_v59 = vld [vmem:[#allocation5 + $0xaa8] sm:$0xff] }
  0xcf   :  { %1263 = vmatpush.msra.mxu3 %v496_v60  ;;  %1218 = vmatpush.msra.mxu1 %v463_v62  ;;  %v546_v60 = vld [vmem:[#allocation5 + $0xb20] sm:$0xff]  ;;  %v563_v61 = vld [vmem:[#allocation5 + $0xba8] sm:$0xff]  ;;  %v513_v62 = vld [vmem:[#allocation5 + $0xa18] sm:$0xff] }
  0xd0   :  { %1242 = vmatpush.msra.mxu2 %v478_v63  ;;  %1197 = vmatmul.f32.vlgmr.msra.gmra.mxu0 %v1981_v0  ;;  %v572_v0 = vld [vmem:[#allocation5 + $0xbf0] sm:$0xff]  ;;  %v530_v63 = vld [vmem:[#allocation5 + $0xaa0] sm:$0xff] }
  0xd1   :  { %1264 = vmatpush.msra.mxu3 %v495_v3  ;;  %1243 = vmatmul.f32.vlgmr.msra.gmra.mxu2 %v1985_v2  ;;  %v522_v2 = vld [vmem:[#allocation5 + $0xa60] sm:$0xff]  ;;  %v545_v3 = vld [vmem:[#allocation5 + $0xb18] sm:$0xff] }
  0xd2   :  { %1273 = vmatpush.msrb.mxu0 %v525_v5  ;;  %1319 = vmatpush.msrb.mxu2 %v557_v8  ;;  %v562_v5 = vld [vmem:[#allocation5 + $0xba0] sm:$0xff]  ;;  %v512_v8 = vld [vmem:[#allocation5 + $0xa10] sm:$0xff] }
  0xd3   :  { %1219 = vmatpush.msra.mxu1 %v462_v6  ;;  %1265 = vmatpush.msra.mxu3 %v494_v4  ;;  %v529_v6 = vld [vmem:[#allocation5 + $0xa98] sm:$0xff]  ;;  %v544_v4 = vld [vmem:[#allocation5 + $0xb10] sm:$0xff] }
  0xd4   :  { %1220 = vmatmul.f32.vlgmr.msra.gmra.mxu1 %v1983_v1  ;;  %1266 = vmatmul.f32.vlgmr.msra.gmra.mxu3 %v1987_v7  ;;  %v748_v1 = vld.sshfl [vmem:[#allocation1 + $0x30] sm:$0xff pattern:$0x73625140] }
  0xd5   :  { %1274 = vmatpush.msrb.mxu0 %v524_v13  ;;  %1296 = vmatpush.msrb.mxu1 %v541_v14  ;;  %v521_v7 = vld [vmem:[#allocation5 + $0xa58] sm:$0xff]  ;;  %v511_v14 = vld [vmem:[#allocation5 + $0xa08] sm:$0xff] }
  0xd6   :  { %1320 = vmatpush.msrb.mxu2 %v556_v15  ;;  %1342 = vmatpush.msrb.mxu3 %v573_v37  ;;  %v561_v13 = vld [vmem:[#allocation5 + $0xb98] sm:$0xff]  ;;  %v528_v15 = vld [vmem:[#allocation5 + $0xa90] sm:$0xff]  ;;  %v543_v37 = vld [vmem:[#allocation5 + $0xb08] sm:$0xff]  ;;  %v830_v46 = vpop.f32.mrf.mxu0 }
  0xd7   :  { %1275 = vmatpush.msrb.mxu0 %v523_v39  ;;  %1297 = vmatpush.msrb.mxu1 %v540_v16  ;;  %v560_v39 = vld [vmem:[#allocation5 + $0xb90] sm:$0xff]  ;;  %v510_v16 = vld [vmem:[#allocation5 + $0xa00] sm:$0xff] }
  0xd8   :  { %1321 = vmatpush.msrb.mxu2 %v555_v17  ;;  %1343 = vmatpush.msrb.mxu3 %v572_v0  ;;  %v527_v17 = vld [vmem:[#allocation5 + $0xa88] sm:$0xff]  ;;  %v542_v0 = vld [vmem:[#allocation5 + $0xb00] sm:$0xff] }
  0xd9   :  { %1276 = vmatpush.msrb.mxu0 %v522_v2  ;;  %1298 = vmatpush.msrb.mxu1 %v539_v38  ;;  %v559_v2 = vld [vmem:[#allocation5 + $0xb88] sm:$0xff]  ;;  %v589_v38 = vld [vmem:[#allocation5 + $0xc78] sm:$0xff] }
  0xda   :  { %1322 = vmatpush.msrb.mxu2 %v554_v40  ;;  %1344 = vmatpush.msrb.mxu3 %v571_v18  ;;  %v526_v40 = vld [vmem:[#allocation5 + $0xa80] sm:$0xff] }
  0xdb   :  { %1200 = vmatmul.f32.gmra.mxu0 %v746_v19  ;;  %1246 = vmatmul.f32.gmra.mxu2 %v748_v1  ;;  %v558_v18 = vld [vmem:[#allocation5 + $0xb80] sm:$0xff]  ;;  %v588_v19 = vld [vmem:[#allocation5 + $0xc70] sm:$0xff]  ;;  %v587_v1 = vld [vmem:[#allocation5 + $0xc68] sm:$0xff] }
  0xdc   :  { %1277 = vmatpush.msrb.mxu0 %v521_v7  ;;  %1299 = vmatpush.msrb.mxu1 %v538_v20  ;;  %v586_v7 = vld [vmem:[#allocation5 + $0xc60] sm:$0xff]  ;;  %v758_v20 = vld.sshfl [vmem:[#allocation1] sm:$0xff pattern:$0x73625140] }
  0xdd   :  { %1323 = vmatpush.msrb.mxu2 %v553_v21  ;;  %1345 = vmatpush.msrb.mxu3 %v570_v22  ;;  %v760_v21 = vld.sshfl [vmem:[#allocation1 + $0x10] sm:$0xff pattern:$0x73625140] }
  0xde   :  { %1223 = vmatmul.f32.gmra.mxu1 %v747_v23  ;;  %1269 = vmatmul.f32.gmra.mxu3 %v749_v24  ;;  %v585_v22 = vld [vmem:[#allocation5 + $0xc58] sm:$0xff]  ;;  %v759_v23 = vld.sshfl [vmem:[#allocation1 + $0x8] sm:$0xff pattern:$0x73625140]  ;;  %v583_v24 = vld [vmem:[#allocation5 + $0xc48] sm:$0xff] }
  0xdf   :  { %1278 = vmatpush.msrb.mxu0 %v520_v25  ;;  %1300 = vmatpush.msrb.mxu1 %v537_v26  ;;  %v168_v25 = vld [vmem:[#allocation2 + $0xf8] sm:$0x3]  ;;  %v182_v26 = vld [vmem:[#allocation2 + $0x15c] sm:$0x3] }
  0xe0   :  { %1324 = vmatpush.msrb.mxu2 %v552_v27  ;;  %1346 = vmatpush.msrb.mxu3 %v569_v32  ;;  %754 = vst [vmem:[#allocation1 + $0x20] ss:$4 sm:$0xff] %v168_v25  ;;  %v582_v27 = vld [vmem:[#allocation5 + $0xc40] sm:$0xff]  ;;  %v581_v32 = vld [vmem:[#allocation5 + $0xc38] sm:$0xff]  ;;  %v1403_v25 = vld [vmem:[%s2096_s3 + $0x48] sm:$0xff] }
  0xe1   :  { %1279 = vmatpush.msrb.mxu0 %v519_v33  ;;  %1301 = vmatpush.msrb.mxu1 %v536_v34  ;;  %756 = vst [vmem:[#allocation1 + $0x22] ss:$4 sm:$0xff] %v182_v26  ;;  %v580_v33 = vld [vmem:[#allocation5 + $0xc30] sm:$0xff]  ;;  %v579_v34 = vld [vmem:[#allocation5 + $0xc28] sm:$0xff] }
  0xe2   :  { %1325 = vmatpush.msrb.mxu2 %v551_v35  ;;  %1347 = vmatpush.msrb.mxu3 %v568_v36  ;;  %v578_v35 = vld [vmem:[#allocation5 + $0xc20] sm:$0xff]  ;;  %v577_v36 = vld [vmem:[#allocation5 + $0xc18] sm:$0xff]  ;;  %v1402_v26 = vld [vmem:[%s2096_s3 + $0x40] sm:$0xff] }
  0xe3   :  { %1280 = vmatpush.msrb.mxu0 %v518_v41  ;;  %1302 = vmatpush.msrb.mxu1 %v535_v42  ;;  %v576_v41 = vld [vmem:[#allocation5 + $0xc10] sm:$0xff]  ;;  %v575_v42 = vld [vmem:[#allocation5 + $0xc08] sm:$0xff] }
  0xe4   :  { %1326 = vmatpush.msrb.mxu2 %v550_v28  ;;  %1348 = vmatpush.msrb.mxu3 %v567_v30  ;;  %v853_v28 = vpop.f32.mrf.mxu1  ;;  %v876_v30 = vpop.f32.mrf.mxu2 }
  0xe5   :  { %1281 = vmatpush.msrb.mxu0 %v517_v47  ;;  %1303 = vmatpush.msrb.mxu1 %v534_v31  ;;  %v899_v47 = vpop.f32.mrf.mxu3 }
  0xe6   :  { %1327 = vmatpush.msrb.mxu2 %v549_v48  ;;  %1349 = vmatpush.msrb.mxu3 %v566_v49 }
  0xe7   :  { %1282 = vmatpush.msrb.mxu0 %v516_v50  ;;  %1304 = vmatpush.msrb.mxu1 %v533_v51 }
  0xe8   :  { %1328 = vmatpush.msrb.mxu2 %v548_v52  ;;  %1350 = vmatpush.msrb.mxu3 %v565_v53 }
  0xe9   :  { %1283 = vmatpush.msrb.mxu0 %v515_v54  ;;  %1305 = vmatpush.msrb.mxu1 %v532_v55  ;;  %v1639_v54 = vld [vmem:[#allocation7] ss:$0 sm:$0xff] }
  0xea   :  { %1329 = vmatpush.msrb.mxu2 %v547_v56  ;;  %1351 = vmatpush.msrb.mxu3 %v564_v57  ;;  %v831_v56 = vadd.f32 %v1639_v54, %v830_v46 }
  0xeb   :  { %1284 = vmatpush.msrb.mxu0 %v514_v58  ;;  %1306 = vmatpush.msrb.mxu1 %v531_v59 }
  0xec   :  { %1330 = vmatpush.msrb.mxu2 %v546_v60  ;;  %1352 = vmatpush.msrb.mxu3 %v563_v61 }
  0xed   :  { %1285 = vmatpush.msrb.mxu0 %v513_v62  ;;  %1307 = vmatpush.msrb.mxu1 %v530_v63 }
  0xee   :  { %1331 = vmatpush.msrb.mxu2 %v545_v3  ;;  %1353 = vmatpush.msrb.mxu3 %v562_v5 }
  0xef   :  { %1286 = vmatpush.msrb.mxu0 %v512_v8  ;;  %1308 = vmatpush.msrb.mxu1 %v529_v6 }
  0xf0   :  { %1332 = vmatpush.msrb.mxu2 %v544_v4  ;;  %1354 = vmatpush.msrb.mxu3 %v561_v13 }
  0xf1   :  { %1287 = vmatpush.msrb.mxu0 %v511_v14  ;;  %1309 = vmatpush.msrb.mxu1 %v528_v15 }
  0xf2   :  { %1333 = vmatpush.msrb.mxu2 %v543_v37  ;;  %1355 = vmatpush.msrb.mxu3 %v560_v39  ;;  %v1409_v39 = vld [vmem:[%s2096_s3 + $0x78] sm:$0xff] }
  0xf3   :  { %1288 = vmatpush.msrb.mxu0 %v510_v16  ;;  %1310 = vmatpush.msrb.mxu1 %v527_v17 }
  0xf4   :  { %1334 = vmatpush.msrb.mxu2 %v542_v0  ;;  %1356 = vmatpush.msrb.mxu3 %v559_v2 }
  0xf5   :  { %1289 = vmatmul.f32.vlgmr.msrb.gmra.mxu0 %v1961_v9  ;;  %1335 = vmatmul.f32.vlgmr.msrb.gmra.mxu2 %v1965_v11  ;;  %v761_v9 = vld.sshfl [vmem:[#allocation1 + $0x18] sm:$0xff pattern:$0x73625140]  ;;  %v584_v11 = vld [vmem:[#allocation5 + $0xc50] sm:$0xff] }
  0xf6   :  { %1365 = vmatpush.msra.mxu0 %v589_v38  ;;  %1311 = vmatpush.msrb.mxu1 %v526_v40  ;;  %v1408_v38 = vld [vmem:[%s2096_s3 + $0x70] sm:$0xff] }
  0xf7   :  { %1357 = vmatpush.msrb.mxu3 %v558_v18  ;;  %1312 = vmatmul.f32.vlgmr.msrb.gmra.mxu1 %v1963_v10  ;;  %v175_v10 = vld [vmem:[#allocation2 + $0x12a] sm:$0x3]  ;;  %v1407_v18 = vld [vmem:[%s2096_s3 + $0x68] sm:$0xff] }
  0xf8   :  { %1358 = vmatmul.f32.vlgmr.msrb.gmra.mxu3 %v1967_v12  ;;  %1366 = vmatpush.msra.mxu0 %v588_v19  ;;  %v189_v12 = vld [vmem:[#allocation2 + $0x18e] sm:$0x3]  ;;  %755 = vst [vmem:[#allocation1 + $0x21] ss:$4 sm:$0xff] %v175_v10  ;;  %v833_v29 = vpop.f32.mrf.mxu0  ;;  %v1406_v19 = vld [vmem:[%s2096_s3 + $0x60] sm:$0xff] }
  0xf9   :  { %757 = vst [vmem:[#allocation1 + $0x23] ss:$4 sm:$0xff] %v189_v12  ;;  %v856_v31 = vpop.f32.mrf.mxu1  ;;  %v834_v60 = vadd.f32 %v1639_v54, %v833_v29  ;;  %1414 = vmatpush.msra.mxu1 %v1409_v39  ;;  %v1395_v54 = vld [vmem:[%s2096_s3 + $0x8] sm:$0xff] }
  0xfa   :  { %1367 = vmatpush.msra.mxu0 %v587_v1 }
  0xfb   :  { %v857_v63 = vadd.f32 %v856_v31, %v834_v60  ;;  %1415 = vmatpush.msra.mxu1 %v1408_v38 }
  0xfc   :  { %1368 = vmatpush.msra.mxu0 %v586_v7 }
  0xfd   :  { %1292 = vmatmul.f32.gmra.mxu0 %v758_v20  ;;  %1338 = vmatmul.f32.gmra.mxu2 %v760_v21  ;;  %v1405_v21 = vld [vmem:[%s2096_s3 + $0x58] sm:$0xff] }
  0xfe   :  { %1369 = vmatpush.msra.mxu0 %v585_v22  ;;  %v879_v48 = vpop.f32.mrf.mxu2  ;;  %1416 = vmatpush.msra.mxu1 %v1407_v18 }
  0xff   :  { %1315 = vmatmul.f32.gmra.mxu1 %v759_v23  ;;  %v902_v50 = vpop.f32.mrf.mxu3  ;;  %v880_v6 = vadd.f32 %v879_v48, %v857_v63 }
 0x100   :  { %1361 = vmatmul.f32.gmra.mxu3 %v761_v9  ;;  %1370 = vmatpush.msra.mxu0 %v584_v11  ;;  %v762_v44 = vld.sshfl [vmem:[#allocation1 + $0x20] sm:$0xff pattern:$0x73625140]  ;;  %v922_v49 = vpop.f32.mrf.mxu0 }
 0x101   :  { %v945_v51 = vpop.f32.mrf.mxu1  ;;  %v903_v15 = vadd.f32 %v902_v50, %v880_v6  ;;  %1417 = vmatpush.msra.mxu1 %v1406_v19  ;;  %v1450_v6 = vld [vmem:[#allocation10 + $0x38] sm:$0xff] }
 0x102   :  { %1371 = vmatpush.msra.mxu0 %v583_v24  ;;  %v1404_v24 = vld [vmem:[%s2096_s3 + $0x50] sm:$0xff]  ;;  %1470 = vmatpush.msra.mxu2 %v1450_v6 }
 0x103   :  { %1418 = vmatpush.msra.mxu1 %v1405_v21 }
 0x104   :  { %1372 = vmatpush.msra.mxu0 %v582_v27 }
 0x105   :  { %1419 = vmatpush.msra.mxu1 %v1404_v24 }
 0x106   :  { %1373 = vmatpush.msra.mxu0 %v581_v32  ;;  %v968_v52 = vpop.f32.mrf.mxu2 }
 0x107   :  { %v991_v55 = vpop.f32.mrf.mxu3  ;;  %1420 = vmatpush.msra.mxu1 %v1403_v25 }
 0x108   :  { %1374 = vmatpush.msra.mxu0 %v580_v33  ;;  %v1401_v33 = vld [vmem:[%s2096_s3 + $0x38] sm:$0xff] }
 0x109   :  { %1421 = vmatpush.msra.mxu1 %v1402_v26 }
 0x10a   :  { %1375 = vmatpush.msra.mxu0 %v579_v34 }
 0x10b   :  { %1422 = vmatpush.msra.mxu1 %v1401_v33 }
 0x10c   :  { %1376 = vmatpush.msra.mxu0 %v578_v35  ;;  %v1400_v35 = vld [vmem:[%s2096_s3 + $0x30] sm:$0xff] }
 0x10d   :  { %1423 = vmatpush.msra.mxu1 %v1400_v35 }
 0x10e   :  { %1377 = vmatpush.msra.mxu0 %v577_v36 }
 0x110   :  { %1378 = vmatpush.msra.mxu0 %v576_v41 }
 0x112   :  { %1379 = vmatpush.msra.mxu0 %v575_v42  ;;  %v1399_v42 = vld [vmem:[%s2096_s3 + $0x28] sm:$0xff] }
 0x113   :  { %1424 = vmatpush.msra.mxu1 %v1399_v42 }
 0x114   :  { %1380 = vmatpush.msra.mxu0 %v574_v43 }
 0x115   :  { %1381 = vmatmul.f32.vlgmr.msra.gmra.mxu0 %v1989_v45  ;;  %v854_v45 = vadd.f32 %v853_v28, %v831_v56  ;;  %v1398_v28 = vld [vmem:[%s2096_s3 + $0x20] sm:$0xff] }
 0x116   :  { %1425 = vmatpush.msra.mxu1 %v1398_v28  ;;  %v1498_v28 = vld [vmem:[%s2100_s7 + $0x38] sm:$0xff] }
 0x117   :  { %v877_v62 = vadd.f32 %v876_v30, %v854_v45  ;;  %1517 = vmatpush.msra.mxu3 %v1498_v28 }
 0x119   :  { %v925_v53 = vpop.f32.mrf.mxu0  ;;  %v900_v5 = vadd.f32 %v899_v47, %v877_v62  ;;  %v1397_v47 = vld [vmem:[%s2096_s3 + $0x18] sm:$0xff] }
 0x11a   :  { %v948_v57 = vpop.f32.mrf.mxu1  ;;  %v926_v17 = vadd.f32 %v925_v53, %v903_v15  ;;  %1426 = vmatpush.msra.mxu1 %v1397_v47  ;;  %v1396_v53 = vld [vmem:[%s2096_s3 + $0x10] sm:$0xff]  ;;  %v1448_v15 = vld [vmem:[#allocation10 + $0x28] sm:$0xff] }
 0x11b   :  { %v923_v13 = vadd.f32 %v922_v49, %v900_v5  ;;  %v1495_v47 = vld [vmem:[%s2100_s7 + $0x20] sm:$0xff] }
 0x11c   :  { %v949_v1 = vadd.f32 %v948_v57, %v926_v17  ;;  %1427 = vmatpush.msra.mxu1 %v1396_v53  ;;  %v1394_v57 = vld [vmem:[%s2096_s3] sm:$0xff] }
 0x11d   :  { %1384 = vmatmul.f32.gmra.mxu0 %v762_v44  ;;  %v946_v37 = vadd.f32 %v945_v51, %v923_v13 }
 0x11e   :  { %1428 = vmatpush.msra.mxu1 %v1395_v54 }
 0x11f   :  { %v971_v58 = vpop.f32.mrf.mxu2  ;;  %v969_v40 = vadd.f32 %v968_v52, %v946_v37 }
 0x120   :  { %v994_v61 = vpop.f32.mrf.mxu3  ;;  %v972_v23 = vadd.f32 %v971_v58, %v949_v1  ;;  %1429 = vmatpush.msra.mxu1 %v1394_v57  ;;  %v1493_v57 = vld [vmem:[%s2100_s7 + $0x10] sm:$0xff] }
 0x121   :  { %v1014_v59 = vpop.f32.mrf.mxu0  ;;  %v992_v20 = vadd.f32 %v991_v55, %v969_v40 }
 0x122   :  { %v1037_v3 = vpop.f32.mrf.mxu1  ;;  %v995_v12 = vadd.f32 %v994_v61, %v972_v23 }
 0x123   :  { %v1015_v9 = vadd.f32 %v1014_v59, %v992_v20 }
 0x125   :  { %v1038_v27 = vadd.f32 %v1037_v3, %v1015_v9 }
 0x127   :  { %v1060_v8 = vpop.f32.mrf.mxu2 }
 0x128   :  { %v1083_v14 = vpop.f32.mrf.mxu3  ;;  %v1061_v34 = vadd.f32 %v1060_v8, %v1038_v27 }
 0x129   :  { %v1017_v4 = vpop.f32.mrf.mxu0 }
 0x12a   :  { %v1040_v16 = vpop.f32.mrf.mxu1  ;;  %v1018_v36 = vadd.f32 %v1017_v4, %v995_v12  ;;  %v1084_v43 = vadd.f32 %v1083_v14, %v1061_v34  ;;  %v1449_v4 = vld [vmem:[#allocation10 + $0x30] sm:$0xff] }
 0x12b   :  { %1471 = vmatpush.msra.mxu2 %v1449_v4  ;;  %v1533_v4 = vlaneseq }
 0x12c   :  { %v1041_v30 = vadd.f32 %v1040_v16, %v1018_v36  ;;  %v1447_v16 = vld [vmem:[#allocation10 + $0x20] sm:$0xff] }
 0x12d   :  { %1472 = vmatpush.msra.mxu2 %v1448_v15 }
 0x12f   :  { %1473 = vmatpush.msra.mxu2 %v1447_v16 }
 0x130   :  { %v1063_v0 = vpop.f32.mrf.mxu2 }
 0x131   :  { %v1106_v2 = vpop.f32.mrf.mxu0  ;;  %v1086_v7 = vpop.f32.mrf.mxu3  ;;  %v1064_v31 = vadd.f32 %v1063_v0, %v1041_v30  ;;  %v1497_v30 = vld [vmem:[%s2100_s7 + $0x30] sm:$0xff] }
 0x132   :  { %v1129_v22 = vpop.f32.mrf.mxu1  ;;  %v1107_v29 = vadd.f32 %v1106_v2, %v1084_v43  ;;  %v1446_v2 = vld [vmem:[#allocation10 + $0x18] sm:$0xff]  ;;  %v1445_v43 = vld [vmem:[#allocation10 + $0x10] sm:$0xff]  ;;  %1518 = vmatpush.msra.mxu3 %v1497_v30 }
 0x133   :  { %v1087_v51 = vadd.f32 %v1086_v7, %v1064_v31  ;;  %1474 = vmatpush.msra.mxu2 %v1446_v2  ;;  %v1494_v31 = vld [vmem:[%s2100_s7 + $0x18] sm:$0xff] }
 0x134   :  { %v1130_v49 = vadd.f32 %v1129_v22, %v1107_v29  ;;  %v1496_v29 = vld [vmem:[%s2100_s7 + $0x28] sm:$0xff] }
 0x135   :  { %1475 = vmatpush.msra.mxu2 %v1445_v43  ;;  %1519 = vmatpush.msra.mxu3 %v1496_v29 }
 0x137   :  { %1520 = vmatpush.msra.mxu3 %v1495_v47 }
 0x138   :  { %v1152_v11 = vpop.f32.mrf.mxu2 }
 0x139   :  { %v1109_v10 = vpop.f32.mrf.mxu0  ;;  %v1175_v32 = vpop.f32.mrf.mxu3  ;;  %v1153_v52 = vadd.f32 %v1152_v11, %v1130_v49  ;;  %1521 = vmatpush.msra.mxu3 %v1494_v31 }
 0x13a   :  { %v1132_v41 = vpop.f32.mrf.mxu1  ;;  %v1110_v56 = vadd.f32 %v1109_v10, %v1087_v51 }
 0x13b   :  { %v1176_v45 = vadd.f32 %v1175_v32, %v1153_v52  ;;  %1522 = vmatpush.msra.mxu3 %v1493_v57 }
 0x13c   :  { %v1133_v60 = vadd.f32 %v1132_v41, %v1110_v56 }
 0x140   :  { %v1155_v44 = vpop.f32.mrf.mxu2 }
 0x141   :  { %v1178_v48 = vpop.f32.mrf.mxu3  ;;  %v1156_v62 = vadd.f32 %v1155_v44, %v1133_v60  ;;  %v1444_v44 = vld [vmem:[#allocation10 + $0x8] sm:$0xff] }
 0x142   :  { %1476 = vmatpush.msra.mxu2 %v1444_v44 }
 0x143   :  { %v1179_v13 = vadd.f32 %v1178_v48, %v1156_v62  ;;  %v1640_v48 = vld [vmem:[#allocation8] ss:$0 sm:$0xff] }
 0x14d   :  { %v1198_v46 = vpop.f32.mrf.mxu0 }
 0x14e   :  { %v1199_v61 = vadd.f32 %v1198_v46, %v1176_v45  ;;  %v1443_v46 = vld [vmem:[#allocation10] sm:$0xff] }
 0x14f   :  { %1477 = vmatpush.msra.mxu2 %v1443_v46  ;;  %v1491_v45 = vld [vmem:[%s2100_s7] sm:$0xff] }
 0x151   :  { %v1221_v50 = vpop.f32.mrf.mxu1 }
 0x152   :  { %v1222_v3 = vadd.f32 %v1221_v50, %v1199_v61 }
 0x154   :  { %v1244_v55 = vpop.f32.mrf.mxu2 }
 0x155   :  { %v1245_v14 = vadd.f32 %v1244_v55, %v1222_v3 }
 0x157   :  { %v1267_v59 = vpop.f32.mrf.mxu3 }
 0x158   :  { %v1201_v58 = vpop.f32.mrf.mxu0  ;;  %v1268_v17 = vadd.f32 %v1267_v59, %v1245_v14  ;;  %v1641_v59 = vld [vmem:[#allocation11] ss:$0 sm:$0xff]  ;;  %v1642_v14 = vld [vmem:[#allocation13] ss:$0 sm:$0xff] }
 0x159   :  { %v1202_v37 = vadd.f32 %v1201_v58, %v1179_v13  ;;  %v1492_v58 = vld [vmem:[%s2100_s7 + $0x8] sm:$0xff]  ;;  %v1534_v13 = vshrl.u32 %v1533_v4, 7 }
 0x15a   :  { %1523 = vmatpush.msra.mxu3 %v1492_v58 }
 0x15b   :  { %v1224_v63 = vpop.f32.mrf.mxu1  ;;  %vm1539_vm7 = vcmp.lt.s32.totalorder %v1534_v13, 2 }
 0x15c   :  { %v1225_v38 = vadd.f32 %v1224_v63, %v1202_v37  ;;  %1524 = vmatpush.msra.mxu3 %v1491_v45 }
 0x15e   :  { %v1247_v5 = vpop.f32.mrf.mxu2 }
 0x15f   :  { %v1248_v19 = vadd.f32 %v1247_v5, %v1225_v38 }
 0x161   :  { %v1270_v39 = vpop.f32.mrf.mxu3 }
 0x162   :  { %v1271_v21 = vadd.f32 %v1270_v39, %v1248_v19 }
 0x172   :  { %v1290_v8 = vpop.f32.mrf.mxu0 }
 0x173   :  { %v1291_v40 = vadd.f32 %v1290_v8, %v1268_v17 }
 0x174   :  { %v1313_v0 = vpop.f32.mrf.mxu1 }
 0x175   :  { %v1314_v7 = vadd.f32 %v1313_v0, %v1291_v40  ;;  %v1864_v0 = vmov -inf  }
 0x176   :  { %v1551_v2 = vsel %vm1547_vm8, 0.0, %v1864_v0 }
 0x178   :  { %v1336_v18 = vpop.f32.mrf.mxu2 }
 0x179   :  { %v1337_v22 = vadd.f32 %v1336_v18, %v1314_v7 }
 0x17a   :  { %v1293_v1 = vpop.f32.mrf.mxu0 }
 0x17b   :  { %v1359_v20 = vpop.f32.mrf.mxu3  ;;  %v1294_v23 = vadd.f32 %v1293_v1, %v1271_v21 }
 0x17c   :  { %v1316_v9 = vpop.f32.mrf.mxu1  ;;  %v1360_v11 = vadd.f32 %v1359_v20, %v1337_v22 }
 0x17d   :  { %v1317_v10 = vadd.f32 %v1316_v9, %v1294_v23 }
 0x180   :  { %v1339_v24 = vpop.f32.mrf.mxu2 }
 0x181   :  { %v1340_v12 = vadd.f32 %v1339_v24, %v1317_v10 }
 0x183   :  { %v1362_v32 = vpop.f32.mrf.mxu3 }
 0x184   :  { %v1363_v34 = vadd.f32 %v1362_v32, %v1340_v12 }
 0x192   :  { %v1382_v25 = vpop.f32.mrf.mxu0 }
 0x193   :  { %v1383_v26 = vadd.f32 %v1382_v25, %v1360_v11 }
 0x195   :  { %vm1388_vm0 = vcmp.ge.f32.partialorder %v1383_v26, 0.0  ;;  %v1390_v27 = vmul.f32 0.01, %v1383_v26 }
 0x197   :  { %v1392_v33 = vsel %vm1388_vm0, %v1383_v26, %v1390_v27 }
 0x198   :  { %1430 = vmatmul.f32.vlgmr.msra.gmra.mxu1 %v1392_v33 }
 0x19a   :  { %v1385_v35 = vpop.f32.mrf.mxu0 }
 0x19b   :  { %v1386_v36 = vadd.f32 %v1385_v35, %v1363_v34 }
 0x19d   :  { %vm1389_vm1 = vcmp.ge.f32.partialorder %v1386_v36, 0.0  ;;  %v1391_v41 = vmul.f32 0.01, %v1386_v36 }
 0x19f   :  { %v1393_v42 = vsel %vm1389_vm1, %v1386_v36, %v1391_v41 }
 0x1a0   :  { %1433 = vmatmul.f32.gmra.mxu1 %v1393_v42 }
 0x215   :  { %v1431_v49 = vpop.f32.mrf.mxu1 }
 0x216   :  { %v1432_v50 = vadd.f32 %v1640_v48, %v1431_v49 }
 0x218   :  { %vm1437_vm2 = vcmp.ge.f32.partialorder %v1432_v50, 0.0  ;;  %v1439_v51 = vmul.f32 0.01, %v1432_v50 }
 0x21a   :  { %v1441_v52 = vsel %vm1437_vm2, %v1432_v50, %v1439_v51 }
 0x21b   :  { %1620 = vmatmul.msk.f32.vlgmr.msra.gmra.mxu2 %vm1455_vm3, %v1441_v52 }
 0x21d   :  { %v1434_v53 = vpop.f32.mrf.mxu1 }
 0x21e   :  { %v1435_v54 = vadd.f32 %v1640_v48, %v1434_v53 }
 0x220   :  { %v1440_v55 = vmul.f32 0.01, %v1435_v54  ;;  %vm1438_vm4 = vcmp.ge.f32.partialorder %v1435_v54, 0.0 }
 0x222   :  { %v1442_v56 = vsel %vm1438_vm4, %v1435_v54, %v1440_v55 }
 0x223   :  { %1621 = vmatmul.msk.f32.gmra.mxu2 %vm1455_vm3, %v1442_v56 }
 0x29e   :  { %v1479_v60 = vpop.f32.mrf.mxu2 }
 0x29f   :  { %v1480_v61 = vadd.f32 %v1641_v59, %v1479_v60 }
 0x2a1   :  { %vm1485_vm5 = vcmp.ge.f32.partialorder %v1480_v61, 0.0  ;;  %v1487_v62 = vmul.f32 0.01, %v1480_v61 }
 0x2a3   :  { %v1489_v63 = vsel %vm1485_vm5, %v1480_v61, %v1487_v62 }
 0x2a4   :  { %1622 = vmatmul.msk.f32.vlgmr.msra.gmra.mxu3 %vm1455_vm3, %v1489_v63 }
 0x2a6   :  { %v1482_v3 = vpop.f32.mrf.mxu2 }
 0x2a7   :  { %v1483_v5 = vadd.f32 %v1641_v59, %v1482_v3 }
 0x2a9   :  { %v1488_v8 = vmul.f32 0.01, %v1483_v5  ;;  %vm1486_vm6 = vcmp.ge.f32.partialorder %v1483_v5, 0.0 }
 0x2ab   :  { %v1490_v6 = vsel %vm1486_vm6, %v1483_v5, %v1488_v8 }
 0x2ac   :  { %1623 = vmatmul.msk.f32.gmra.mxu3 %vm1455_vm3, %v1490_v6 }
 0x327   :  { %v1526_v15 = vpop.f32.mrf.mxu3 }
 0x328   :  { %v1527_v37 = vadd.f32 %v1642_v14, %v1526_v15 }
 0x32a   :  { %v1545_v39 = vsel %vm1539_vm7, %v1527_v37, 0.0 }
 0x32b   :  { %v1548_v16 = vsel %vm1547_vm8, %v1545_v39, -inf }
 0x32c   :  { %1549 = vmax.xlane.f32.xlu0 %v1548_v16 }
 0x32f   :  { %v1529_v17 = vpop.f32.mrf.mxu3 }
 0x334   :  { %1552 = vmax.xlane.f32.xlu0 %v1551_v2 }
 0x39f   :  { %v1550_v38 = vpop.xlane.xlu0 %1549 }
 0x3a0   :  { %v1554_v40 = vsub.f32 %v1545_v39, %v1550_v38 }
 0x3a2   :  { %v1556_v18 = vmul.f32 1.442695, %v1554_v40 }
 0x3a4   :  { %1643 = vpow2.f32 %v1556_v18 }
 0x3a7   :  { %v1553_v19 = vpop.xlane.xlu0 %1552 }
 0x3a8   :  { %v1555_v1 = vsub.f32 0.0, %v1553_v19 }
 0x3aa   :  { %v1644_v7 = vpop.eup %1643  ;;  %v1558_v20 = vmul.f32 1.442695, %v1555_v1 }
 0x3ab   :  { %v1560_v21 = vsel %vm1547_vm8, %v1644_v7, 0.0 }
 0x3ac   :  { %1645 = vpow2.f32 %v1558_v20  ;;  %1561 = vadd.xlane.f32.xlu1 %v1560_v21 }
 0x3b2   :  { %v1646_v22 = vpop.eup %1645 }
 0x3b3   :  { %v1563_v23 = vsel %vm1547_vm8, %v1646_v22, 0.0 }
 0x3b4   :  { %1564 = vadd.xlane.f32.xlu1 %v1563_v23 }
 0x41f   :  { %v1562_v9 = vpop.xlane.xlu1 %1561 }
 0x420   :  { %1647 = vrcp.f32 %v1562_v9  ;;  %v1577_v26 = vand.u32 2147483648, %v1562_v9  ;;  %v1575_v27 = vand.u32 2147483647, %v1562_v9  ;;  %vm1571_vm10 = vweird.f32 %v1562_v9 }
 0x422   :  { %v1578_v34 = vor.u32 1.1754944e-38, %v1577_v26  ;;  %vm1576_vm12 = vcmp.eq.f32.partialorder %v1575_v27, 8.507059e+37 }
 0x426   :  { %v1648_v11 = vpop.eup %1647 }
 0x427   :  { %v1567_v24 = vmul.f32 %v1648_v11, %v1562_v9  ;;  %v1565_v25 = vpop.xlane.xlu1 %1564  ;;  %vm1572_vm9 = vweird.f32 %v1648_v11 }
 0x428   :  { %1649 = vrcp.f32 %v1565_v25  ;;  %vm1573_vm11 = vmor %vm1571_vm10, %vm1572_vm9  ;;  %v1592_v44 = vand.u32 2147483648, %v1565_v25  ;;  %v1590_v28 = vand.u32 2147483647, %v1565_v25  ;;  %vm1586_vm14 = vweird.f32 %v1565_v25 }
 0x429   :  { %v1568_v10 = vsub.f32 1.0, %v1567_v24 }
 0x42a   :  { %v1593_v29 = vor.u32 1.1754944e-38, %v1592_v44  ;;  %vm1591_vm0 = vcmp.eq.f32.partialorder %v1590_v28, 8.507059e+37 }
 0x42b   :  { %v1569_v12 = vmul.f32 %v1648_v11, %v1568_v10 }
 0x42d   :  { %v1570_v32 = vadd.f32 %v1648_v11, %v1569_v12 }
 0x42e   :  { %v1650_v33 = vpop.eup %1649 }
 0x42f   :  { %v1574_v35 = vsel %vm1573_vm11, %v1648_v11, %v1570_v32  ;;  %v1582_v36 = vmul.f32 %v1650_v33, %v1565_v25  ;;  %vm1587_vm13 = vweird.f32 %v1650_v33 }
 0x430   :  { %v1579_v41 = vsel %vm1576_vm12, %v1578_v34, %v1574_v35  ;;  %vm1588_vm15 = vmor %vm1586_vm14, %vm1587_vm13 }
 0x431   :  { %v1580_v42 = vmul.f32 %v1644_v7, %v1579_v41  ;;  %v1583_v43 = vsub.f32 1.0, %v1582_v36 }
 0x433   :  { %1596 = vst.msk [vmem:[#allocation14] sm:$0xff] %vm1547_vm8, %v1580_v42  ;;  %v1584_v46 = vmul.f32 %v1650_v33, %v1583_v43 }
 0x435   :  { %v1585_v30 = vadd.f32 %v1650_v33, %v1584_v46 }
 0x437   :  { %v1589_v47 = vsel %vm1588_vm15, %v1650_v33, %v1585_v30 }
 0x438   :  { %v1594_v31 = vsel %vm1591_vm0, %v1593_v29, %v1589_v47 }
 0x439   :  { %v1595_v48 = vmul.f32 %v1646_v22, %v1594_v31 }
 0x43b   :  { %1597 = vst.msk [vmem:[#allocation14 + $0x8] sm:$0xff] %vm1547_vm8, %v1595_v48 }
 0x43c   :  { %1601 = vsyncadd [#allocation4], 224  ;;  %s1604_s15 = sshll.u32 %s2102_s9, 4  ;;  %s1865_s16 = smov [#allocation14]   ;;  %s1605_s15 = int_to_ptr.hbm [resolvable:$true] %s1604_s15 }
 0x43d   :  { %s1602_s19 = sshll.u32 %s1865_s16, 4  ;;  %s1866_s20 = smov 32   ;;  %s1603_s19 = int_to_ptr.vmem [resolvable:$true] %s1602_s19 }
 0x43e   :  { %s1867_s21 = smov 2  }
 0x43f   :  { %1610 = dma.vmem_to_hbm [thread:$0]  %s1603_s19, 32, %s1605_s15, [#allocation4], %s1866_s20, %s1866_s20, %s1867_s21  }
 0x440   :  { %1851 = dma.done.wait [#allocation4], 256  }
 0x441   :  { %1852 = vsyncadd [#allocation4], 4294967040 }
 0x442   :  { %1615 = vsyncpa [#allocation3], 1 }
 0x443   :  { %1616 = vsyncpa [#allocation6], 1 }
 0x444   :  { %1617 = vsyncpa [#allocation9], 1 }
 0x445   :  { %1618 = vsyncpa [#allocation12], 1 }
 0x446   :  { %1619 = vsyncpa [#allocation4], 1 }

</bundles_post_ra>
